<compile_context>
chip_gen: v6e
topology: v6e:2x2x1
jax: 0.10.0
libtpu: 0.0.40
codegen_flags: <defaults>
</compile_context>

<pallas_src>
import functools
import math

import jax
import jax.numpy as jnp
from jax import lax
from jax.experimental import pallas as pl
from jax.experimental.pallas import tpu as pltpu

EPS = 1e-5  # torch.nn.LayerNorm default


# ---------------------------------------------------------------------------
# in-kernel helpers (operate on 2-D (M, dim) f32 tiles)
# ---------------------------------------------------------------------------
def _layernorm_f32(x, g, b):
    # single reduction pass: var = E[x^2] - mu^2
    mu = jnp.mean(x, axis=-1, keepdims=True)
    ex2 = jnp.mean(x * x, axis=-1, keepdims=True)
    var = ex2 - mu * mu
    return (x - mu) * lax.rsqrt(var + EPS) * g + b


def _gelu_exact(x):
    # torch.nn.GELU default (erf form)
    return 0.5 * x * (1.0 + lax.erf(x * (1.0 / math.sqrt(2.0))))


def _quick_gelu(x):
    return x * jax.nn.sigmoid(1.702 * x)


# ---------------------------------------------------------------------------
# Pallas kernel: the whole encoder.  grid = (batch_block, layer)
# ---------------------------------------------------------------------------
def _encoder_kernel(g, hd,
                    x_ref, pos_ref,
                    ln1_g, ln1_b, w_q, w_k, w_v, w_po, b_po,
                    ln2_g, ln2_b, w_f1, b_f1, w_f2, b_f2,
                    aln_g, aln_b, w_a1, b_a1, w_a2, b_a2,
                    o_ref, resid_ref):
    l = pl.program_id(1)
    bt, n, c = o_ref.shape
    ng = w_q.shape[0]                      # number of head groups
    m = bt * n
    scale = hd ** -0.5

    @pl.when(l == 0)
    def _():
        resid_ref[...] = x_ref[...].astype(jnp.float32)

    # positional embedding is added at EVERY layer:  x_{l+1} = Block(x_l + pos)
    x = (resid_ref[...] + pos_ref[...].astype(jnp.float32)).reshape(m, c)

    # ---- self-attention (no qkv bias, eval-mode dropout) ---------------------
    h = _layernorm_f32(x, ln1_g[...], ln1_b[...]).astype(jnp.bfloat16)
    # proj bias folded into the accumulator init (saves one (M,C) add)
    attn = jnp.broadcast_to(b_po[...], (m, c))
    for gi in range(ng):                   # static unroll over head *groups*
        # grouped projections: G*hd-wide MXU outputs; softmax scale folded into q
        q = jnp.dot(h, w_q[gi], preferred_element_type=jnp.float32) * scale
        k = jnp.dot(h, w_k[gi], preferred_element_type=jnp.float32)
        v = jnp.dot(h, w_v[gi], preferred_element_type=jnp.float32)
        q = q.astype(jnp.bfloat16)
        k = k.astype(jnp.bfloat16)
        v = v.astype(jnp.bfloat16)
        o_heads = []
        for hi in range(g):                # per-head score / PV (flash pattern)
            lo, hi_ = hi * hd, (hi + 1) * hd
            qh = q[:, lo:hi_].reshape(bt, n, hd)
            kh = k[:, lo:hi_].reshape(bt, n, hd)
            vh = v[:, lo:hi_].reshape(bt, n, hd)
            s = jnp.einsum("bqd,bkd->bqk", qh, kh,
                           preferred_element_type=jnp.float32)          # (Bt,N,N)
            s = s - jnp.max(s, axis=-1, keepdims=True)
            p = jnp.exp(s)
            p = p * pl.reciprocal(jnp.sum(p, axis=-1, keepdims=True), approx=True)
            oh = jnp.einsum("bqk,bkd->bqd", p.astype(jnp.bfloat16), vh,
                            preferred_element_type=jnp.float32)         # (Bt,N,hd)
            o_heads.append(oh.reshape(m, hd).astype(jnp.bfloat16))
        o2 = o_heads[0] if g == 1 else jnp.concatenate(o_heads, axis=-1)
        # output projection folded in as a grouped accumulation (G*hd-deep contraction)
        attn = attn + jnp.dot(o2, w_po[gi], preferred_element_type=jnp.float32)
    x = x + attn

    # ---- MLP -----------------------------------------------------------------
    h2 = _layernorm_f32(x, ln2_g[...], ln2_b[...]).astype(jnp.bfloat16)
    f1 = jnp.dot(h2, w_f1[...], preferred_element_type=jnp.float32) + b_f1[...]
    f1 = _gelu_exact(f1).astype(jnp.bfloat16)     # exact erf == torch.nn.GELU
    x = x + jnp.dot(f1, w_f2[...], preferred_element_type=jnp.float32) + b_f2[...]

    # ---- Adapter on non-cls tokens (token 0 of each sequence passes through) -
    a = _layernorm_f32(x, aln_g[...], aln_b[...]).astype(jnp.bfloat16)
    a = jnp.dot(a, w_a1[...], preferred_element_type=jnp.float32) + b_a1[...]
    a = _quick_gelu(a).astype(jnp.bfloat16)
    a = jnp.dot(a, w_a2[...], preferred_element_type=jnp.float32) + b_a2[...]
    a = 0.7 * a

    tok = lax.broadcasted_iota(jnp.int32, (bt, n, 1), 1)   # token index in sequence
    keep = (tok > 0).astype(jnp.float32)                   # cls (token 0) -> 0
    out = x.reshape(bt, n, c) + keep * a.reshape(bt, n, c)

    resid_ref[...] = out                    # residual stays resident across layers
    @pl.when(l == pl.num_programs(1) - 1)
    def _():
        o_ref[...] = out.astype(o_ref.dtype)


# ---------------------------------------------------------------------------
# wrapper helpers
# ---------------------------------------------------------------------------
_WEIGHT_ORDER = ("ln1_g", "ln1_b", "w_q", "w_k", "w_v", "w_proj", "b_proj",
                 "ln2_g", "ln2_b", "w_fc1", "b_fc1", "w_fc2", "b_fc2",
                 "a_ln_g", "a_ln_b", "w_a1", "b_a1", "w_a2", "b_a2")


def _layer_index_map(ndim):
    zeros = (0,) * (ndim - 1)
    return lambda b, l: (l,) + zeros


def _physical_vmem_bytes():
    try:
        info = pltpu.get_tpu_info()
        for attr in ("vmem_capacity_bytes", "vmem_size_bytes", "vmem_bytes"):
            v = getattr(info, attr, None)
            if v:
                return int(v)
    except Exception:
        pass
    return 64 * 2 ** 20            # conservative default: v7x per-TC VMEM


def _pick_batch_block(batch, seq, phys_vmem):
    # v7x (64 MiB VMEM): <=256-row tiles; v5e/v6e (128 MiB): <=512-row tiles.
    max_rows = 256 if phys_vmem <= 64 * 2 ** 20 else 512
    divs = [d for d in range(1, batch + 1) if batch % d == 0 and d * seq <= max_rows]
    if not divs:
        return 1
    for min_steps in (4, 2):       # >=4 grid steps => >=2 per TensorCore on v7x megacore
        ok = [d for d in divs if batch // d >= min_steps]
        if ok:
            return max(ok)
    return max(divs)


def _vmem_limit_bytes(per_layer_w_bytes, bt, seq, c, hidden, phys_vmem):
    tile = bt * seq * c * 4
    m = bt * seq
    act = 2 * 2 * tile + 2 * seq * c * 4      # double-buffered x/out tiles + pos
    wts = 2 * per_layer_w_bytes               # weights double-buffered over the layer axis
    scratch = tile                            # resident f32 residual
    interm = 8 * m * c * 4 + 6 * m * hidden   # live f32/bf16 temporaries (MLP hidden dominates)
    est = act + wts + scratch + interm
    lo = 16 * 2 ** 20
    hi = int(0.8 * phys_vmem)                 # headroom for Mosaic internal scratch
    return int(min(hi, max(lo, int(1.3 * est))))


def _pick_head_group(num_heads, head_dim, max_width=256):
    # largest G | num_heads with G*head_dim <= 256 (128-wide on v5e is still dense)
    for cand in range(num_heads, 0, -1):
        if num_heads % cand == 0 and cand * head_dim <= max_width:
            return cand
    return 1


def _group_heads(p, num_heads, head_dim, g):
    """(nh, C, hd) -> (ng, C, g*hd) head-major columns; (nh, hd, C) -> (ng, g*hd, C)."""
    ng = num_heads // g
    dim = p["w_q"].shape[1]

    def qkv(w):
        return (w.reshape(ng, g, dim, head_dim)
                 .transpose(0, 2, 1, 3)
                 .reshape(ng, dim, g * head_dim))

    out = dict(p)
    out["w_q"], out["w_k"], out["w_v"] = qkv(p["w_q"]), qkv(p["w_k"]), qkv(p["w_v"])
    out["w_proj"] = p["w_proj"].reshape(ng, g * head_dim, dim)
    return out


# ---------------------------------------------------------------------------
# encoder forward: one pallas_call over (batch blocks, depth)
# ---------------------------------------------------------------------------
def transformer_encoder_forward(x, pos, block_params, num_heads, head_dim,
                                batch_block=None):
    B, N, C = x.shape
    depth = len(block_params)
    phys = _physical_vmem_bytes()
    bt = _pick_batch_block(B, N, phys) if batch_block is None else batch_block
    assert B % bt == 0, (B, bt)

    g = _pick_head_group(num_heads, head_dim)
    grouped = [_group_heads(p, num_heads, head_dim, g) for p in block_params]
    stacked = {k: jnp.stack([p[k] for p in grouped], axis=0) for k in _WEIGHT_ORDER}
    weights = [stacked[k] for k in _WEIGHT_ORDER]
    per_layer_w_bytes = sum(int(w.size) * w.dtype.itemsize for w in weights) // depth
    hidden = stacked["w_fc1"].shape[-1]

    tile_spec = pl.BlockSpec((bt, N, C), lambda b, l: (b, 0, 0))
    if pos.shape[0] == 1:                      # batch-invariant pos: single DMA
        pos_spec = pl.BlockSpec((1, N, C), lambda b, l: (0, 0, 0))
    else:
        pos_spec = pl.BlockSpec((bt, N, C), lambda b, l: (b, 0, 0))
    w_specs = [pl.BlockSpec((pl.Squeezed(),) + tuple(w.shape[1:]),
                            _layer_index_map(w.ndim)) for w in weights]

    kernel = functools.partial(_encoder_kernel, g, head_dim)

    return pl.pallas_call(
        kernel,
        out_shape=jax.ShapeDtypeStruct((B, N, C), x.dtype),
        grid=(B // bt, depth),
        in_specs=[tile_spec, pos_spec] + w_specs,
        out_specs=tile_spec,
        scratch_shapes=[pltpu.VMEM((bt, N, C), jnp.float32)],
        compiler_params=pltpu.CompilerParams(
            dimension_semantics=("parallel", "arbitrary"),
            vmem_limit_bytes=_vmem_limit_bytes(per_layer_w_bytes, bt, N, C,
                                               hidden, phys)),
    )(x, pos, *weights)


# ---------------------------------------------------------------------------
# deterministic parameter init (shapes from the module __init__), per-head layout
# ---------------------------------------------------------------------------
def _uniform(key, shape, bound):
    return jax.random.uniform(key, shape, jnp.float32, -bound, bound)


def init_block_params(key, dim, num_heads, mlp_hidden, reduction):
    hd = dim // num_heads
    ks = jax.random.split(key, 13)
    bd = 1.0 / math.sqrt(dim)
    bh = 1.0 / math.sqrt(mlp_hidden)
    br = 1.0 / math.sqrt(reduction)

    w_q = _uniform(ks[0], (num_heads, dim, hd), bd)      # qkv_bias=False
    w_k = _uniform(ks[1], (num_heads, dim, hd), bd)
    w_v = _uniform(ks[2], (num_heads, dim, hd), bd)
    w_proj = _uniform(ks[3], (num_heads, hd, dim), bd)
    b_proj = _uniform(ks[4], (1, dim), bd)
    w_fc1 = _uniform(ks[5], (dim, mlp_hidden), bd)
    b_fc1 = _uniform(ks[6], (1, mlp_hidden), bd)
    w_fc2 = _uniform(ks[7], (mlp_hidden, dim), bh)
    b_fc2 = _uniform(ks[8], (1, dim), bh)
    w_a1 = _uniform(ks[9], (dim, reduction), bd)          # Adapter.ln1
    b_a1 = _uniform(ks[10], (1, reduction), bd)
    w_a2 = _uniform(ks[11], (reduction, dim), br)         # Adapter.ln2
    b_a2 = _uniform(ks[12], (1, dim), br)

    bf16 = jnp.bfloat16
    ones = jnp.ones((1, dim), jnp.float32)
    zeros = jnp.zeros((1, dim), jnp.float32)
    return dict(
        ln1_g=ones, ln1_b=zeros,
        w_q=w_q.astype(bf16), w_k=w_k.astype(bf16), w_v=w_v.astype(bf16),
        w_proj=w_proj.astype(bf16), b_proj=b_proj,
        ln2_g=ones, ln2_b=zeros,
        w_fc1=w_fc1.astype(bf16), b_fc1=b_fc1,
        w_fc2=w_fc2.astype(bf16), b_fc2=b_fc2,
        a_ln_g=ones, a_ln_b=zeros,
        w_a1=w_a1.astype(bf16), b_a1=b_a1,
        w_a2=w_a2.astype(bf16), b_a2=b_a2,
    )


# ---------------------------------------------------------------------------
# pure-JAX reference (f32 math, same bf16-stored weights) for correctness
# ---------------------------------------------------------------------------
def _ref_layernorm(v, g, b):
    mu = v.mean(-1, keepdims=True)
    var = ((v - mu) ** 2).mean(-1, keepdims=True)
    return (v - mu) / jnp.sqrt(var + EPS) * g + b


def _ref_block(x, p):
    hp = lax.Precision.HIGHEST
    f32 = jnp.float32
    wq, wk, wv = (p[k].astype(f32) for k in ("w_q", "w_k", "w_v"))
    wpo = p["w_proj"].astype(f32)
    hd = wq.shape[-1]

    h = _ref_layernorm(x, p["ln1_g"], p["ln1_b"])
    q = jnp.einsum("bnc,hcd->bhnd", h, wq, precision=hp)
    k = jnp.einsum("bnc,hcd->bhnd", h, wk, precision=hp)
    v = jnp.einsum("bnc,hcd->bhnd", h, wv, precision=hp)
    s = jnp.einsum("bhqd,bhkd->bhqk", q, k, precision=hp) * (hd ** -0.5)
    pat = jax.nn.softmax(s, axis=-1)
    o = jnp.einsum("bhqk,bhkd->bhqd", pat, v, precision=hp)
    x = x + jnp.einsum("bhnd,hdc->bnc", o, wpo, precision=hp) + p["b_proj"]

    h2 = _ref_layernorm(x, p["ln2_g"], p["ln2_b"])
    h2 = jnp.dot(h2, p["w_fc1"].astype(f32), precision=hp) + p["b_fc1"]
    h2 = jax.nn.gelu(h2, approximate=False)
    x = x + jnp.dot(h2, p["w_fc2"].astype(f32), precision=hp) + p["b_fc2"]

    a = _ref_layernorm(x, p["a_ln_g"], p["a_ln_b"])
    a = jnp.dot(a, p["w_a1"].astype(f32), precision=hp) + p["b_a1"]
    a = a * jax.nn.sigmoid(1.702 * a)
    a = 0.7 * (jnp.dot(a, p["w_a2"].astype(f32), precision=hp) + p["b_a2"])
    cls_x, rest = x[:, :1], x[:, 1:]
    return jnp.concatenate([cls_x, rest + a[:, 1:]], axis=1)


def _ref_encoder(x, pos, block_params):
    for p in block_params:
        x = _ref_block(x + pos, p)
    return x


# ---------------------------------------------------------------------------
if __name__ == "__main__":
    B, N, C = 4, 8, 128            # batch, sequence (incl. cls token), embed_dim (lane-dense)
    num_heads = 2                  # head_dim = 64 (ViT-style)
    depth = 2
    mlp_hidden = int(C * 4.0)
    reduction = 16                 # Adapter reduction_dims (hardcoded in Block)
    hd = C // num_heads

    key = jax.random.PRNGKey(0)
    kx, kp, kb = jax.random.split(key, 3)
    x = jax.random.normal(kx, (B, N, C), jnp.float32)
    pos = jax.random.normal(kp, (1, N, C), jnp.float32)   # batch-invariant pos_embed
    block_params = [init_block_params(k, C, num_heads, mlp_hidden, reduction)
                    for k in jax.random.split(kb, depth)]

    run = jax.jit(lambda xx, pp, bp: transformer_encoder_forward(xx, pp, bp, num_heads, hd))
    out = run(x, pos, block_params)
    jax.block_until_ready(out)

    ref = _ref_encoder(x, pos, block_params)
    assert out.shape == (B, N, C)
    err = float(jnp.max(jnp.abs(out - ref)))
    # bf16 matmul inputs (f32 accumulation) vs f32 reference on the same weights
    assert jnp.allclose(out, ref, rtol=3e-2, atol=3e-2), err

    # TODO(synk): prompt-token insertion and the point-cloud propagation branches
    # (global_feature / level*_center / level*_index) are data-dependent gathers
    # outside this kernel's scope and are not implemented.
    print("KERNEL_OK")
</pallas_src>

<mosaic_0001>
module attributes {stable_mosaic.version = 11 : i64} {
  func.func @_encoder_kernel(%arg0: i32, %arg1: i32, %arg2: memref<1x8x128xf32, #tpu.memory_space<vmem>>, %arg3: memref<1x8x128xf32, #tpu.memory_space<vmem>>, %arg4: memref<1x1x128xf32, #tpu.memory_space<vmem>>, %arg5: memref<1x1x128xf32, #tpu.memory_space<vmem>>, %arg6: memref<1x1x128x128xbf16, #tpu.memory_space<vmem>>, %arg7: memref<1x1x128x128xbf16, #tpu.memory_space<vmem>>, %arg8: memref<1x1x128x128xbf16, #tpu.memory_space<vmem>>, %arg9: memref<1x1x128x128xbf16, #tpu.memory_space<vmem>>, %arg10: memref<1x1x128xf32, #tpu.memory_space<vmem>>, %arg11: memref<1x1x128xf32, #tpu.memory_space<vmem>>, %arg12: memref<1x1x128xf32, #tpu.memory_space<vmem>>, %arg13: memref<1x128x512xbf16, #tpu.memory_space<vmem>>, %arg14: memref<1x1x512xf32, #tpu.memory_space<vmem>>, %arg15: memref<1x512x128xbf16, #tpu.memory_space<vmem>>, %arg16: memref<1x1x128xf32, #tpu.memory_space<vmem>>, %arg17: memref<1x1x128xf32, #tpu.memory_space<vmem>>, %arg18: memref<1x1x128xf32, #tpu.memory_space<vmem>>, %arg19: memref<1x128x16xbf16, #tpu.memory_space<vmem>>, %arg20: memref<1x1x16xf32, #tpu.memory_space<vmem>>, %arg21: memref<1x16x128xbf16, #tpu.memory_space<vmem>>, %arg22: memref<1x1x128xf32, #tpu.memory_space<vmem>>, %arg23: memref<1x8x128xf32, #tpu.memory_space<vmem>>, %arg24: memref<1x8x128xf32, #tpu.memory_space<vmem>>) attributes {dimension_semantics = [#tpu.dimension_semantics<parallel>, #tpu.dimension_semantics<arbitrary>], iteration_bounds = array<i64: 4, 2>, scalar_prefetch = 0 : i64, scratch_operands = 1 : i64, tpu.core_type = #tpu.core_type<tc>, window_params = [{transform_indices = @transform_0, window_bounds = array<i64: 1, 8, 128>}, {pipeline_mode = #tpu.pipeline_mode<synchronous>, transform_indices = @transform_1, window_bounds = array<i64: 1, 8, 128>}, {transform_indices = @transform_2, window_bounds = array<i64: 1, 1, 128>}, {transform_indices = @transform_3, window_bounds = array<i64: 1, 1, 128>}, {transform_indices = @transform_4, window_bounds = array<i64: 1, 1, 128, 128>}, {transform_indices = @transform_5, window_bounds = array<i64: 1, 1, 128, 128>}, {transform_indices = @transform_6, window_bounds = array<i64: 1, 1, 128, 128>}, {transform_indices = @transform_7, window_bounds = array<i64: 1, 1, 128, 128>}, {transform_indices = @transform_8, window_bounds = array<i64: 1, 1, 128>}, {transform_indices = @transform_9, window_bounds = array<i64: 1, 1, 128>}, {transform_indices = @transform_10, window_bounds = array<i64: 1, 1, 128>}, {transform_indices = @transform_11, window_bounds = array<i64: 1, 128, 512>}, {transform_indices = @transform_12, window_bounds = array<i64: 1, 1, 512>}, {transform_indices = @transform_13, window_bounds = array<i64: 1, 512, 128>}, {transform_indices = @transform_14, window_bounds = array<i64: 1, 1, 128>}, {transform_indices = @transform_15, window_bounds = array<i64: 1, 1, 128>}, {transform_indices = @transform_16, window_bounds = array<i64: 1, 1, 128>}, {transform_indices = @transform_17, window_bounds = array<i64: 1, 128, 16>}, {transform_indices = @transform_18, window_bounds = array<i64: 1, 1, 16>}, {transform_indices = @transform_19, window_bounds = array<i64: 1, 16, 128>}, {transform_indices = @transform_20, window_bounds = array<i64: 1, 1, 128>}, {transform_indices = @transform_21, window_bounds = array<i64: 1, 8, 128>}]} {
    %c0_i32 = arith.constant 0 : i32
    %0 = arith.cmpi eq, %arg1, %c0_i32 : i32
    %1 = arith.extui %0 : i1 to i32
    %c0_i32_0 = arith.constant 0 : i32
    %2 = arith.cmpi ne, %1, %c0_i32_0 : i32
    scf.if %2 {
      %c0_109 = arith.constant 0 : index
      %c0_110 = arith.constant 0 : index
      %c0_111 = arith.constant 0 : index
      %217 = vector.load %arg2[%c0_109, %c0_110, %c0_111] : memref<1x8x128xf32, #tpu.memory_space<vmem>>, vector<1x8x128xf32>
      %c0_112 = arith.constant 0 : index
      %c0_113 = arith.constant 0 : index
      %c0_114 = arith.constant 0 : index
      %218 = vector.load %arg24[%c0_112, %c0_113, %c0_114] : memref<1x8x128xf32, #tpu.memory_space<vmem>>, vector<1x8x128xf32>
      tpu.vector_store %arg24[%c0_112, %c0_113, %c0_114], %217 {strides = array<i32>} : memref<1x8x128xf32, #tpu.memory_space<vmem>>, vector<1x8x128xf32>,
    } else {
    }
    %c0 = arith.constant 0 : index
    %c0_1 = arith.constant 0 : index
    %c0_2 = arith.constant 0 : index
    %3 = vector.load %arg24[%c0, %c0_1, %c0_2] : memref<1x8x128xf32, #tpu.memory_space<vmem>>, vector<1x8x128xf32>
    %c0_3 = arith.constant 0 : index
    %c0_4 = arith.constant 0 : index
    %c0_5 = arith.constant 0 : index
    %4 = vector.load %arg3[%c0_3, %c0_4, %c0_5] : memref<1x8x128xf32, #tpu.memory_space<vmem>>, vector<1x8x128xf32>
    %5 = arith.addf %3, %4 : vector<1x8x128xf32>
    %6 = vector.shape_cast %5 : vector<1x8x128xf32> to vector<8x128xf32>
    %c0_6 = arith.constant 0 : index
    %c0_7 = arith.constant 0 : index
    %c0_8 = arith.constant 0 : index
    %7 = vector.load %arg4[%c0_6, %c0_7, %c0_8] : memref<1x1x128xf32, #tpu.memory_space<vmem>>, vector<1x1x128xf32>
    %8 = vector.shape_cast %7 : vector<1x1x128xf32> to vector<1x128xf32>
    %c0_9 = arith.constant 0 : index
    %c0_10 = arith.constant 0 : index
    %c0_11 = arith.constant 0 : index
    %9 = vector.load %arg5[%c0_9, %c0_10, %c0_11] : memref<1x1x128xf32, #tpu.memory_space<vmem>>, vector<1x1x128xf32>
    %10 = vector.shape_cast %9 : vector<1x1x128xf32> to vector<1x128xf32>
    %cst = arith.constant dense<0.000000e+00> : vector<8xf32>
    %11 = vector.multi_reduction <add>, %6, %cst [1] : vector<8x128xf32> to vector<8xf32>
    %12 = vector.shape_cast %11 : vector<8xf32> to vector<8x1xf32>
    %cst_12 = arith.constant 1.280000e+02 : f32
    %13 = vector.broadcast %cst_12 : f32 to vector<8x1xf32>
    %14 = arith.divf %12, %13 : vector<8x1xf32>
    %15 = arith.mulf %6, %6 : vector<8x128xf32>
    %cst_13 = arith.constant dense<0.000000e+00> : vector<8xf32>
    %16 = vector.multi_reduction <add>, %15, %cst_13 [1] : vector<8x128xf32> to vector<8xf32>
    %17 = vector.shape_cast %16 : vector<8xf32> to vector<8x1xf32>
    %cst_14 = arith.constant 1.280000e+02 : f32
    %18 = vector.broadcast %cst_14 : f32 to vector<8x1xf32>
    %19 = arith.divf %17, %18 : vector<8x1xf32>
    %20 = arith.mulf %14, %14 : vector<8x1xf32>
    %21 = arith.subf %19, %20 : vector<8x1xf32>
    %22 = vector.broadcast %14 : vector<8x1xf32> to vector<8x128xf32>
    %23 = arith.subf %6, %22 : vector<8x128xf32>
    %cst_15 = arith.constant 9.99999974E-6 : f32
    %24 = vector.broadcast %cst_15 : f32 to vector<8x1xf32>
    %25 = arith.addf %21, %24 : vector<8x1xf32>
    %26 = math.rsqrt %25 : vector<8x1xf32>
    %27 = vector.broadcast %26 : vector<8x1xf32> to vector<8x128xf32>
    %28 = arith.mulf %23, %27 : vector<8x128xf32>
    %29 = vector.broadcast %8 : vector<1x128xf32> to vector<8x128xf32>
    %30 = arith.mulf %28, %29 : vector<8x128xf32>
    %31 = vector.broadcast %10 : vector<1x128xf32> to vector<8x128xf32>
    %32 = arith.addf %30, %31 : vector<8x128xf32>
    %33 = arith.truncf %32 : vector<8x128xf32> to vector<8x128xbf16>
    %c0_16 = arith.constant 0 : index
    %c0_17 = arith.constant 0 : index
    %c0_18 = arith.constant 0 : index
    %34 = vector.load %arg10[%c0_16, %c0_17, %c0_18] : memref<1x1x128xf32, #tpu.memory_space<vmem>>, vector<1x1x128xf32>
    %35 = vector.shape_cast %34 : vector<1x1x128xf32> to vector<1x128xf32>
    %36 = vector.shape_cast %35 : vector<1x128xf32> to vector<1x128xf32>
    %37 = vector.broadcast %36 : vector<1x128xf32> to vector<8x128xf32>
    %c0_19 = arith.constant 0 : index
    %c0_20 = arith.constant 0 : index
    %c0_21 = arith.constant 0 : index
    %c0_22 = arith.constant 0 : index
    %38 = vector.load %arg6[%c0_19, %c0_20, %c0_21, %c0_22] : memref<1x1x128x128xbf16, #tpu.memory_space<vmem>>, vector<1x1x128x128xbf16>
    %39 = vector.shape_cast %38 : vector<1x1x128x128xbf16> to vector<128x128xbf16>
    %cst_23 = arith.constant dense<0.000000e+00> : vector<8x128xf32>
    %40 = tpu.matmul %33, %39, %cst_23 {dimension_numbers = #tpu.dot_dimension_numbers<[1], [0], [0], [1], [0, 0, 1, 1], [], []>} : vector<8x128xbf16>, vector<128x128xbf16>, vector<8x128xf32> -> vector<8x128xf32>
    %cst_24 = arith.constant 1.250000e-01 : f32
    %41 = vector.broadcast %cst_24 : f32 to vector<8x128xf32>
    %42 = arith.mulf %40, %41 : vector<8x128xf32>
    %c0_25 = arith.constant 0 : index
    %c0_26 = arith.constant 0 : index
    %c0_27 = arith.constant 0 : index
    %c0_28 = arith.constant 0 : index
    %43 = vector.load %arg7[%c0_25, %c0_26, %c0_27, %c0_28] : memref<1x1x128x128xbf16, #tpu.memory_space<vmem>>, vector<1x1x128x128xbf16>
    %44 = vector.shape_cast %43 : vector<1x1x128x128xbf16> to vector<128x128xbf16>
    %cst_29 = arith.constant dense<0.000000e+00> : vector<8x128xf32>
    %45 = tpu.matmul %33, %44, %cst_29 {dimension_numbers = #tpu.dot_dimension_numbers<[1], [0], [0], [1], [0, 0, 1, 1], [], []>} : vector<8x128xbf16>, vector<128x128xbf16>, vector<8x128xf32> -> vector<8x128xf32>
    %c0_30 = arith.constant 0 : index
    %c0_31 = arith.constant 0 : index
    %c0_32 = arith.constant 0 : index
    %c0_33 = arith.constant 0 : index
    %46 = vector.load %arg8[%c0_30, %c0_31, %c0_32, %c0_33] : memref<1x1x128x128xbf16, #tpu.memory_space<vmem>>, vector<1x1x128x128xbf16>
    %47 = vector.shape_cast %46 : vector<1x1x128x128xbf16> to vector<128x128xbf16>
    %cst_34 = arith.constant dense<0.000000e+00> : vector<8x128xf32>
    %48 = tpu.matmul %33, %47, %cst_34 {dimension_numbers = #tpu.dot_dimension_numbers<[1], [0], [0], [1], [0, 0, 1, 1], [], []>} : vector<8x128xbf16>, vector<128x128xbf16>, vector<8x128xf32> -> vector<8x128xf32>
    %49 = arith.truncf %42 : vector<8x128xf32> to vector<8x128xbf16>
    %50 = arith.truncf %45 : vector<8x128xf32> to vector<8x128xbf16>
    %51 = arith.truncf %48 : vector<8x128xf32> to vector<8x128xbf16>
    %52 = vector.extract_strided_slice %49 {offsets = [0, 0], sizes = [8, 64], strides = [1, 1]} : vector<8x128xbf16> to vector<8x64xbf16>
    %53 = vector.shape_cast %52 : vector<8x64xbf16> to vector<1x8x64xbf16>
    %54 = vector.extract_strided_slice %50 {offsets = [0, 0], sizes = [8, 64], strides = [1, 1]} : vector<8x128xbf16> to vector<8x64xbf16>
    %55 = vector.shape_cast %54 : vector<8x64xbf16> to vector<1x8x64xbf16>
    %56 = vector.extract_strided_slice %51 {offsets = [0, 0], sizes = [8, 64], strides = [1, 1]} : vector<8x128xbf16> to vector<8x64xbf16>
    %57 = vector.shape_cast %56 : vector<8x64xbf16> to vector<1x8x64xbf16>
    "tpu.trace_start"() <{level = 10 : i32, message = "bqd,bkd->bqk"}> : () -> ()
    %cst_35 = arith.constant dense<0.000000e+00> : vector<1x8x8xf32>
    %58 = tpu.matmul %53, %55, %cst_35 {dimension_numbers = #tpu.dot_dimension_numbers<[2], [2], [1], [1], [0, 0, 0, 1, 1, 1], [0], [0]>} : vector<1x8x64xbf16>, vector<1x8x64xbf16>, vector<1x8x8xf32> -> vector<1x8x8xf32>
    "tpu.trace_stop"() : () -> ()
    %cst_36 = arith.constant dense<0xFF800000> : vector<1x8xf32>
    %59 = vector.multi_reduction <maximumf>, %58, %cst_36 [2] : vector<1x8x8xf32> to vector<1x8xf32>
    %60 = vector.shape_cast %59 : vector<1x8xf32> to vector<1x8x1xf32>
    %61 = vector.broadcast %60 : vector<1x8x1xf32> to vector<1x8x8xf32>
    %62 = arith.subf %58, %61 : vector<1x8x8xf32>
    %63 = math.exp %62 : vector<1x8x8xf32>
    %cst_37 = arith.constant dense<0.000000e+00> : vector<1x8xf32>
    %64 = vector.multi_reduction <add>, %63, %cst_37 [2] : vector<1x8x8xf32> to vector<1x8xf32>
    %65 = vector.shape_cast %64 : vector<1x8xf32> to vector<1x8x1xf32>
    %66 = tpu.reciprocal %65 {approx = true} : vector<1x8x1xf32> -> vector<1x8x1xf32>
    %67 = vector.broadcast %66 : vector<1x8x1xf32> to vector<1x8x8xf32>
    %68 = arith.mulf %63, %67 : vector<1x8x8xf32>
    %69 = arith.truncf %68 : vector<1x8x8xf32> to vector<1x8x8xbf16>
    "tpu.trace_start"() <{level = 10 : i32, message = "bqk,bkd->bqd"}> : () -> ()
    %cst_38 = arith.constant dense<0.000000e+00> : vector<1x8x64xf32>
    %70 = tpu.matmul %69, %57, %cst_38 {dimension_numbers = #tpu.dot_dimension_numbers<[2], [1], [1], [2], [0, 0, 0, 1, 1, 2], [0], [0]>} : vector<1x8x8xbf16>, vector<1x8x64xbf16>, vector<1x8x64xf32> -> vector<1x8x64xf32>
    "tpu.trace_stop"() : () -> ()
    %71 = vector.shape_cast %70 : vector<1x8x64xf32> to vector<8x64xf32>
    %72 = arith.truncf %71 : vector<8x64xf32> to vector<8x64xbf16>
    %73 = vector.extract_strided_slice %49 {offsets = [0, 64], sizes = [8, 64], strides = [1, 1]} : vector<8x128xbf16> to vector<8x64xbf16>
    %74 = vector.shape_cast %73 : vector<8x64xbf16> to vector<1x8x64xbf16>
    %75 = vector.extract_strided_slice %50 {offsets = [0, 64], sizes = [8, 64], strides = [1, 1]} : vector<8x128xbf16> to vector<8x64xbf16>
    %76 = vector.shape_cast %75 : vector<8x64xbf16> to vector<1x8x64xbf16>
    %77 = vector.extract_strided_slice %51 {offsets = [0, 64], sizes = [8, 64], strides = [1, 1]} : vector<8x128xbf16> to vector<8x64xbf16>
    %78 = vector.shape_cast %77 : vector<8x64xbf16> to vector<1x8x64xbf16>
    "tpu.trace_start"() <{level = 10 : i32, message = "bqd,bkd->bqk"}> : () -> ()
    %cst_39 = arith.constant dense<0.000000e+00> : vector<1x8x8xf32>
    %79 = tpu.matmul %74, %76, %cst_39 {dimension_numbers = #tpu.dot_dimension_numbers<[2], [2], [1], [1], [0, 0, 0, 1, 1, 1], [0], [0]>} : vector<1x8x64xbf16>, vector<1x8x64xbf16>, vector<1x8x8xf32> -> vector<1x8x8xf32>
    "tpu.trace_stop"() : () -> ()
    %cst_40 = arith.constant dense<0xFF800000> : vector<1x8xf32>
    %80 = vector.multi_reduction <maximumf>, %79, %cst_40 [2] : vector<1x8x8xf32> to vector<1x8xf32>
    %81 = vector.shape_cast %80 : vector<1x8xf32> to vector<1x8x1xf32>
    %82 = vector.broadcast %81 : vector<1x8x1xf32> to vector<1x8x8xf32>
    %83 = arith.subf %79, %82 : vector<1x8x8xf32>
    %84 = math.exp %83 : vector<1x8x8xf32>
    %cst_41 = arith.constant dense<0.000000e+00> : vector<1x8xf32>
    %85 = vector.multi_reduction <add>, %84, %cst_41 [2] : vector<1x8x8xf32> to vector<1x8xf32>
    %86 = vector.shape_cast %85 : vector<1x8xf32> to vector<1x8x1xf32>
    %87 = tpu.reciprocal %86 {approx = true} : vector<1x8x1xf32> -> vector<1x8x1xf32>
    %88 = vector.broadcast %87 : vector<1x8x1xf32> to vector<1x8x8xf32>
    %89 = arith.mulf %84, %88 : vector<1x8x8xf32>
    %90 = arith.truncf %89 : vector<1x8x8xf32> to vector<1x8x8xbf16>
    "tpu.trace_start"() <{level = 10 : i32, message = "bqk,bkd->bqd"}> : () -> ()
    %cst_42 = arith.constant dense<0.000000e+00> : vector<1x8x64xf32>
    %91 = tpu.matmul %90, %78, %cst_42 {dimension_numbers = #tpu.dot_dimension_numbers<[2], [1], [1], [2], [0, 0, 0, 1, 1, 2], [0], [0]>} : vector<1x8x8xbf16>, vector<1x8x64xbf16>, vector<1x8x64xf32> -> vector<1x8x64xf32>
    "tpu.trace_stop"() : () -> ()
    %92 = vector.shape_cast %91 : vector<1x8x64xf32> to vector<8x64xf32>
    %93 = arith.truncf %92 : vector<8x64xf32> to vector<8x64xbf16>
    %94 = tpu.concatenate %72, %93 in 1 : vector<8x64xbf16>, vector<8x64xbf16> -> vector<8x128xbf16>
    %c0_43 = arith.constant 0 : index
    %c0_44 = arith.constant 0 : index
    %c0_45 = arith.constant 0 : index
    %c0_46 = arith.constant 0 : index
    %95 = vector.load %arg9[%c0_43, %c0_44, %c0_45, %c0_46] : memref<1x1x128x128xbf16, #tpu.memory_space<vmem>>, vector<1x1x128x128xbf16>
    %96 = vector.shape_cast %95 : vector<1x1x128x128xbf16> to vector<128x128xbf16>
    %cst_47 = arith.constant dense<0.000000e+00> : vector<8x128xf32>
    %97 = tpu.matmul %94, %96, %cst_47 {dimension_numbers = #tpu.dot_dimension_numbers<[1], [0], [0], [1], [0, 0, 1, 1], [], []>} : vector<8x128xbf16>, vector<128x128xbf16>, vector<8x128xf32> -> vector<8x128xf32>
    %98 = arith.addf %37, %97 : vector<8x128xf32>
    %99 = arith.addf %6, %98 : vector<8x128xf32>
    %c0_48 = arith.constant 0 : index
    %c0_49 = arith.constant 0 : index
    %c0_50 = arith.constant 0 : index
    %100 = vector.load %arg11[%c0_48, %c0_49, %c0_50] : memref<1x1x128xf32, #tpu.memory_space<vmem>>, vector<1x1x128xf32>
    %101 = vector.shape_cast %100 : vector<1x1x128xf32> to vector<1x128xf32>
    %c0_51 = arith.constant 0 : index
    %c0_52 = arith.constant 0 : index
    %c0_53 = arith.constant 0 : index
    %102 = vector.load %arg12[%c0_51, %c0_52, %c0_53] : memref<1x1x128xf32, #tpu.memory_space<vmem>>, vector<1x1x128xf32>
    %103 = vector.shape_cast %102 : vector<1x1x128xf32> to vector<1x128xf32>
    %cst_54 = arith.constant dense<0.000000e+00> : vector<8xf32>
    %104 = vector.multi_reduction <add>, %99, %cst_54 [1] : vector<8x128xf32> to vector<8xf32>
    %105 = vector.shape_cast %104 : vector<8xf32> to vector<8x1xf32>
    %cst_55 = arith.constant 1.280000e+02 : f32
    %106 = vector.broadcast %cst_55 : f32 to vector<8x1xf32>
    %107 = arith.divf %105, %106 : vector<8x1xf32>
    %108 = arith.mulf %99, %99 : vector<8x128xf32>
    %cst_56 = arith.constant dense<0.000000e+00> : vector<8xf32>
    %109 = vector.multi_reduction <add>, %108, %cst_56 [1] : vector<8x128xf32> to vector<8xf32>
    %110 = vector.shape_cast %109 : vector<8xf32> to vector<8x1xf32>
    %cst_57 = arith.constant 1.280000e+02 : f32
    %111 = vector.broadcast %cst_57 : f32 to vector<8x1xf32>
    %112 = arith.divf %110, %111 : vector<8x1xf32>
    %113 = arith.mulf %107, %107 : vector<8x1xf32>
    %114 = arith.subf %112, %113 : vector<8x1xf32>
    %115 = vector.broadcast %107 : vector<8x1xf32> to vector<8x128xf32>
    %116 = arith.subf %99, %115 : vector<8x128xf32>
    %cst_58 = arith.constant 9.99999974E-6 : f32
    %117 = vector.broadcast %cst_58 : f32 to vector<8x1xf32>
    %118 = arith.addf %114, %117 : vector<8x1xf32>
    %119 = math.rsqrt %118 : vector<8x1xf32>
    %120 = vector.broadcast %119 : vector<8x1xf32> to vector<8x128xf32>
    %121 = arith.mulf %116, %120 : vector<8x128xf32>
    %122 = vector.broadcast %101 : vector<1x128xf32> to vector<8x128xf32>
    %123 = arith.mulf %121, %122 : vector<8x128xf32>
    %124 = vector.broadcast %103 : vector<1x128xf32> to vector<8x128xf32>
    %125 = arith.addf %123, %124 : vector<8x128xf32>
    %126 = arith.truncf %125 : vector<8x128xf32> to vector<8x128xbf16>
    %c0_59 = arith.constant 0 : index
    %c0_60 = arith.constant 0 : index
    %c0_61 = arith.constant 0 : index
    %127 = vector.load %arg13[%c0_59, %c0_60, %c0_61] : memref<1x128x512xbf16, #tpu.memory_space<vmem>>, vector<1x128x512xbf16>
    %128 = vector.shape_cast %127 : vector<1x128x512xbf16> to vector<128x512xbf16>
    %cst_62 = arith.constant dense<0.000000e+00> : vector<8x512xf32>
    %129 = tpu.matmul %126, %128, %cst_62 {dimension_numbers = #tpu.dot_dimension_numbers<[1], [0], [0], [1], [0, 0, 1, 1], [], []>} : vector<8x128xbf16>, vector<128x512xbf16>, vector<8x512xf32> -> vector<8x512xf32>
    %c0_63 = arith.constant 0 : index
    %c0_64 = arith.constant 0 : index
    %c0_65 = arith.constant 0 : index
    %130 = vector.load %arg14[%c0_63, %c0_64, %c0_65] : memref<1x1x512xf32, #tpu.memory_space<vmem>>, vector<1x1x512xf32>
    %131 = vector.shape_cast %130 : vector<1x1x512xf32> to vector<1x512xf32>
    %132 = vector.broadcast %131 : vector<1x512xf32> to vector<8x512xf32>
    %133 = arith.addf %129, %132 : vector<8x512xf32>
    %cst_66 = arith.constant 5.000000e-01 : f32
    %134 = vector.broadcast %cst_66 : f32 to vector<8x512xf32>
    %135 = arith.mulf %134, %133 : vector<8x512xf32>
    %cst_67 = arith.constant 0.707106769 : f32
    %136 = vector.broadcast %cst_67 : f32 to vector<8x512xf32>
    %137 = arith.mulf %133, %136 : vector<8x512xf32>
    %138 = math.erf %137 : vector<8x512xf32>
    %cst_68 = arith.constant 1.000000e+00 : f32
    %139 = vector.broadcast %cst_68 : f32 to vector<8x512xf32>
    %140 = arith.addf %139, %138 : vector<8x512xf32>
    %141 = arith.mulf %135, %140 : vector<8x512xf32>
    %142 = arith.truncf %141 : vector<8x512xf32> to vector<8x512xbf16>
    %c0_69 = arith.constant 0 : index
    %c0_70 = arith.constant 0 : index
    %c0_71 = arith.constant 0 : index
    %143 = vector.load %arg15[%c0_69, %c0_70, %c0_71] : memref<1x512x128xbf16, #tpu.memory_space<vmem>>, vector<1x512x128xbf16>
    %144 = vector.shape_cast %143 : vector<1x512x128xbf16> to vector<512x128xbf16>
    %cst_72 = arith.constant dense<0.000000e+00> : vector<8x128xf32>
    %145 = tpu.matmul %142, %144, %cst_72 {dimension_numbers = #tpu.dot_dimension_numbers<[1], [0], [0], [1], [0, 0, 1, 1], [], []>} : vector<8x512xbf16>, vector<512x128xbf16>, vector<8x128xf32> -> vector<8x128xf32>
    %146 = arith.addf %99, %145 : vector<8x128xf32>
    %c0_73 = arith.constant 0 : index
    %c0_74 = arith.constant 0 : index
    %c0_75 = arith.constant 0 : index
    %147 = vector.load %arg16[%c0_73, %c0_74, %c0_75] : memref<1x1x128xf32, #tpu.memory_space<vmem>>, vector<1x1x128xf32>
    %148 = vector.shape_cast %147 : vector<1x1x128xf32> to vector<1x128xf32>
    %149 = vector.broadcast %148 : vector<1x128xf32> to vector<8x128xf32>
    %150 = arith.addf %146, %149 : vector<8x128xf32>
    %c0_76 = arith.constant 0 : index
    %c0_77 = arith.constant 0 : index
    %c0_78 = arith.constant 0 : index
    %151 = vector.load %arg17[%c0_76, %c0_77, %c0_78] : memref<1x1x128xf32, #tpu.memory_space<vmem>>, vector<1x1x128xf32>
    %152 = vector.shape_cast %151 : vector<1x1x128xf32> to vector<1x128xf32>
    %c0_79 = arith.constant 0 : index
    %c0_80 = arith.constant 0 : index
    %c0_81 = arith.constant 0 : index
    %153 = vector.load %arg18[%c0_79, %c0_80, %c0_81] : memref<1x1x128xf32, #tpu.memory_space<vmem>>, vector<1x1x128xf32>
    %154 = vector.shape_cast %153 : vector<1x1x128xf32> to vector<1x128xf32>
    %cst_82 = arith.constant dense<0.000000e+00> : vector<8xf32>
    %155 = vector.multi_reduction <add>, %150, %cst_82 [1] : vector<8x128xf32> to vector<8xf32>
    %156 = vector.shape_cast %155 : vector<8xf32> to vector<8x1xf32>
    %cst_83 = arith.constant 1.280000e+02 : f32
    %157 = vector.broadcast %cst_83 : f32 to vector<8x1xf32>
    %158 = arith.divf %156, %157 : vector<8x1xf32>
    %159 = arith.mulf %150, %150 : vector<8x128xf32>
    %cst_84 = arith.constant dense<0.000000e+00> : vector<8xf32>
    %160 = vector.multi_reduction <add>, %159, %cst_84 [1] : vector<8x128xf32> to vector<8xf32>
    %161 = vector.shape_cast %160 : vector<8xf32> to vector<8x1xf32>
    %cst_85 = arith.constant 1.280000e+02 : f32
    %162 = vector.broadcast %cst_85 : f32 to vector<8x1xf32>
    %163 = arith.divf %161, %162 : vector<8x1xf32>
    %164 = arith.mulf %158, %158 : vector<8x1xf32>
    %165 = arith.subf %163, %164 : vector<8x1xf32>
    %166 = vector.broadcast %158 : vector<8x1xf32> to vector<8x128xf32>
    %167 = arith.subf %150, %166 : vector<8x128xf32>
    %cst_86 = arith.constant 9.99999974E-6 : f32
    %168 = vector.broadcast %cst_86 : f32 to vector<8x1xf32>
    %169 = arith.addf %165, %168 : vector<8x1xf32>
    %170 = math.rsqrt %169 : vector<8x1xf32>
    %171 = vector.broadcast %170 : vector<8x1xf32> to vector<8x128xf32>
    %172 = arith.mulf %167, %171 : vector<8x128xf32>
    %173 = vector.broadcast %152 : vector<1x128xf32> to vector<8x128xf32>
    %174 = arith.mulf %172, %173 : vector<8x128xf32>
    %175 = vector.broadcast %154 : vector<1x128xf32> to vector<8x128xf32>
    %176 = arith.addf %174, %175 : vector<8x128xf32>
    %177 = arith.truncf %176 : vector<8x128xf32> to vector<8x128xbf16>
    %c0_87 = arith.constant 0 : index
    %c0_88 = arith.constant 0 : index
    %c0_89 = arith.constant 0 : index
    %178 = vector.load %arg19[%c0_87, %c0_88, %c0_89] : memref<1x128x16xbf16, #tpu.memory_space<vmem>>, vector<1x128x16xbf16>
    %179 = vector.shape_cast %178 : vector<1x128x16xbf16> to vector<128x16xbf16>
    %cst_90 = arith.constant dense<0.000000e+00> : vector<8x16xf32>
    %180 = tpu.matmul %177, %179, %cst_90 {dimension_numbers = #tpu.dot_dimension_numbers<[1], [0], [0], [1], [0, 0, 1, 1], [], []>} : vector<8x128xbf16>, vector<128x16xbf16>, vector<8x16xf32> -> vector<8x16xf32>
    %c0_91 = arith.constant 0 : index
    %c0_92 = arith.constant 0 : index
    %c0_93 = arith.constant 0 : index
    %181 = vector.load %arg20[%c0_91, %c0_92, %c0_93] : memref<1x1x16xf32, #tpu.memory_space<vmem>>, vector<1x1x16xf32>
    %182 = vector.shape_cast %181 : vector<1x1x16xf32> to vector<1x16xf32>
    %183 = vector.broadcast %182 : vector<1x16xf32> to vector<8x16xf32>
    %184 = arith.addf %180, %183 : vector<8x16xf32>
    %cst_94 = arith.constant 1.702000e+00 : f32
    %185 = vector.broadcast %cst_94 : f32 to vector<8x16xf32>
    %186 = arith.mulf %185, %184 : vector<8x16xf32>
    %187 = arith.negf %186 : vector<8x16xf32>
    %188 = math.exp %187 : vector<8x16xf32>
    %cst_95 = arith.constant 1.000000e+00 : f32
    %189 = vector.broadcast %cst_95 : f32 to vector<8x16xf32>
    %190 = arith.addf %189, %188 : vector<8x16xf32>
    %191 = arith.divf %189, %190 : vector<8x16xf32>
    %192 = arith.mulf %184, %191 : vector<8x16xf32>
    %193 = arith.truncf %192 : vector<8x16xf32> to vector<8x16xbf16>
    %c0_96 = arith.constant 0 : index
    %c0_97 = arith.constant 0 : index
    %c0_98 = arith.constant 0 : index
    %194 = vector.load %arg21[%c0_96, %c0_97, %c0_98] : memref<1x16x128xbf16, #tpu.memory_space<vmem>>, vector<1x16x128xbf16>
    %195 = vector.shape_cast %194 : vector<1x16x128xbf16> to vector<16x128xbf16>
    %cst_99 = arith.constant dense<0.000000e+00> : vector<8x128xf32>
    %196 = tpu.matmul %193, %195, %cst_99 {dimension_numbers = #tpu.dot_dimension_numbers<[1], [0], [0], [1], [0, 0, 1, 1], [], []>} : vector<8x16xbf16>, vector<16x128xbf16>, vector<8x128xf32> -> vector<8x128xf32>
    %c0_100 = arith.constant 0 : index
    %c0_101 = arith.constant 0 : index
    %c0_102 = arith.constant 0 : index
    %197 = vector.load %arg22[%c0_100, %c0_101, %c0_102] : memref<1x1x128xf32, #tpu.memory_space<vmem>>, vector<1x1x128xf32>
    %198 = vector.shape_cast %197 : vector<1x1x128xf32> to vector<1x128xf32>
    %199 = vector.broadcast %198 : vector<1x128xf32> to vector<8x128xf32>
    %200 = arith.addf %196, %199 : vector<8x128xf32>
    %cst_103 = arith.constant 0.699999988 : f32
    %201 = vector.broadcast %cst_103 : f32 to vector<8x128xf32>
    %202 = arith.mulf %201, %200 : vector<8x128xf32>
    %203 = tpu.iota {dimensions = array<i32: 1>} : vector<1x8x1xi32>
    %c0_i32_104 = arith.constant 0 : i32
    %204 = vector.broadcast %c0_i32_104 : i32 to vector<1x8x1xi32>
    %205 = arith.cmpi sgt, %203, %204 : vector<1x8x1xi32>
    %206 = arith.extui %205 : vector<1x8x1xi1> to vector<1x8x1xi32>
    %207 = arith.sitofp %206 : vector<1x8x1xi32> to vector<1x8x1xf32>
    %208 = vector.shape_cast %150 : vector<8x128xf32> to vector<1x8x128xf32>
    %209 = vector.shape_cast %202 : vector<8x128xf32> to vector<1x8x128xf32>
    %210 = vector.broadcast %207 : vector<1x8x1xf32> to vector<1x8x128xf32>
    %211 = arith.mulf %210, %209 : vector<1x8x128xf32>
    %212 = arith.addf %208, %211 : vector<1x8x128xf32>
    %c0_105 = arith.constant 0 : index
    %c0_106 = arith.constant 0 : index
    %c0_107 = arith.constant 0 : index
    %213 = vector.load %arg24[%c0_105, %c0_106, %c0_107] : memref<1x8x128xf32, #tpu.memory_space<vmem>>, vector<1x8x128xf32>
    tpu.vector_store %arg24[%c0_105, %c0_106, %c0_107], %212 {strides = array<i32>} : memref<1x8x128xf32, #tpu.memory_space<vmem>>, vector<1x8x128xf32>,
    %c1_i32 = arith.constant 1 : i32
    %214 = arith.cmpi eq, %arg1, %c1_i32 : i32
    %215 = arith.extui %214 : i1 to i32
    %c0_i32_108 = arith.constant 0 : i32
    %216 = arith.cmpi ne, %215, %c0_i32_108 : i32
    scf.if %216 {
      %c0_109 = arith.constant 0 : index
      %c0_110 = arith.constant 0 : index
      %c0_111 = arith.constant 0 : index
      %217 = vector.load %arg23[%c0_109, %c0_110, %c0_111] : memref<1x8x128xf32, #tpu.memory_space<vmem>>, vector<1x8x128xf32>
      tpu.vector_store %arg23[%c0_109, %c0_110, %c0_111], %212 {strides = array<i32>} : memref<1x8x128xf32, #tpu.memory_space<vmem>>, vector<1x8x128xf32>,
    } else {
    }
    return
  }
  func.func @transform_0(%arg0: i32, %arg1: i32) -> (i32, i32, i32) {
    %c0_i32 = arith.constant 0 : i32
    %c0_i32_0 = arith.constant 0 : i32
    %c0_i32_1 = arith.constant 0 : i32
    return %arg0, %c0_i32, %c0_i32_0 : i32, i32, i32
  }
  func.func @transform_1(%arg0: i32, %arg1: i32) -> (i32, i32, i32) {
    %c0_i32 = arith.constant 0 : i32
    %c0_i32_0 = arith.constant 0 : i32
    %c0_i32_1 = arith.constant 0 : i32
    %c0_i32_2 = arith.constant 0 : i32
    return %c0_i32, %c0_i32_0, %c0_i32_1 : i32, i32, i32
  }
  func.func @transform_2(%arg0: i32, %arg1: i32) -> (i32, i32, i32) {
    %c0_i32 = arith.constant 0 : i32
    %c0_i32_0 = arith.constant 0 : i32
    %c0_i32_1 = arith.constant 0 : i32
    return %arg1, %c0_i32, %c0_i32_0 : i32, i32, i32
  }
  func.func @transform_3(%arg0: i32, %arg1: i32) -> (i32, i32, i32) {
    %c0_i32 = arith.constant 0 : i32
    %c0_i32_0 = arith.constant 0 : i32
    %c0_i32_1 = arith.constant 0 : i32
    return %arg1, %c0_i32, %c0_i32_0 : i32, i32, i32
  }
  func.func @transform_4(%arg0: i32, %arg1: i32) -> (i32, i32, i32, i32) {
    %c0_i32 = arith.constant 0 : i32
    %c0_i32_0 = arith.constant 0 : i32
    %c0_i32_1 = arith.constant 0 : i32
    %c0_i32_2 = arith.constant 0 : i32
    return %arg1, %c0_i32, %c0_i32_0, %c0_i32_1 : i32, i32, i32, i32
  }
  func.func @transform_5(%arg0: i32, %arg1: i32) -> (i32, i32, i32, i32) {
    %c0_i32 = arith.constant 0 : i32
    %c0_i32_0 = arith.constant 0 : i32
    %c0_i32_1 = arith.constant 0 : i32
    %c0_i32_2 = arith.constant 0 : i32
    return %arg1, %c0_i32, %c0_i32_0, %c0_i32_1 : i32, i32, i32, i32
  }
  func.func @transform_6(%arg0: i32, %arg1: i32) -> (i32, i32, i32, i32) {
    %c0_i32 = arith.constant 0 : i32
    %c0_i32_0 = arith.constant 0 : i32
    %c0_i32_1 = arith.constant 0 : i32
    %c0_i32_2 = arith.constant 0 : i32
    return %arg1, %c0_i32, %c0_i32_0, %c0_i32_1 : i32, i32, i32, i32
  }
  func.func @transform_7(%arg0: i32, %arg1: i32) -> (i32, i32, i32, i32) {
    %c0_i32 = arith.constant 0 : i32
    %c0_i32_0 = arith.constant 0 : i32
    %c0_i32_1 = arith.constant 0 : i32
    %c0_i32_2 = arith.constant 0 : i32
    return %arg1, %c0_i32, %c0_i32_0, %c0_i32_1 : i32, i32, i32, i32
  }
  func.func @transform_8(%arg0: i32, %arg1: i32) -> (i32, i32, i32) {
    %c0_i32 = arith.constant 0 : i32
    %c0_i32_0 = arith.constant 0 : i32
    %c0_i32_1 = arith.constant 0 : i32
    return %arg1, %c0_i32, %c0_i32_0 : i32, i32, i32
  }
  func.func @transform_9(%arg0: i32, %arg1: i32) -> (i32, i32, i32) {
    %c0_i32 = arith.constant 0 : i32
    %c0_i32_0 = arith.constant 0 : i32
    %c0_i32_1 = arith.constant 0 : i32
    return %arg1, %c0_i32, %c0_i32_0 : i32, i32, i32
  }
  func.func @transform_10(%arg0: i32, %arg1: i32) -> (i32, i32, i32) {
    %c0_i32 = arith.constant 0 : i32
    %c0_i32_0 = arith.constant 0 : i32
    %c0_i32_1 = arith.constant 0 : i32
    return %arg1, %c0_i32, %c0_i32_0 : i32, i32, i32
  }
  func.func @transform_11(%arg0: i32, %arg1: i32) -> (i32, i32, i32) {
    %c0_i32 = arith.constant 0 : i32
    %c0_i32_0 = arith.constant 0 : i32
    %c0_i32_1 = arith.constant 0 : i32
    return %arg1, %c0_i32, %c0_i32_0 : i32, i32, i32
  }
  func.func @transform_12(%arg0: i32, %arg1: i32) -> (i32, i32, i32) {
    %c0_i32 = arith.constant 0 : i32
    %c0_i32_0 = arith.constant 0 : i32
    %c0_i32_1 = arith.constant 0 : i32
    return %arg1, %c0_i32, %c0_i32_0 : i32, i32, i32
  }
  func.func @transform_13(%arg0: i32, %arg1: i32) -> (i32, i32, i32) {
    %c0_i32 = arith.constant 0 : i32
    %c0_i32_0 = arith.constant 0 : i32
    %c0_i32_1 = arith.constant 0 : i32
    return %arg1, %c0_i32, %c0_i32_0 : i32, i32, i32
  }
  func.func @transform_14(%arg0: i32, %arg1: i32) -> (i32, i32, i32) {
    %c0_i32 = arith.constant 0 : i32
    %c0_i32_0 = arith.constant 0 : i32
    %c0_i32_1 = arith.constant 0 : i32
    return %arg1, %c0_i32, %c0_i32_0 : i32, i32, i32
  }
  func.func @transform_15(%arg0: i32, %arg1: i32) -> (i32, i32, i32) {
    %c0_i32 = arith.constant 0 : i32
    %c0_i32_0 = arith.constant 0 : i32
    %c0_i32_1 = arith.constant 0 : i32
    return %arg1, %c0_i32, %c0_i32_0 : i32, i32, i32
  }
  func.func @transform_16(%arg0: i32, %arg1: i32) -> (i32, i32, i32) {
    %c0_i32 = arith.constant 0 : i32
    %c0_i32_0 = arith.constant 0 : i32
    %c0_i32_1 = arith.constant 0 : i32
    return %arg1, %c0_i32, %c0_i32_0 : i32, i32, i32
  }
  func.func @transform_17(%arg0: i32, %arg1: i32) -> (i32, i32, i32) {
    %c0_i32 = arith.constant 0 : i32
    %c0_i32_0 = arith.constant 0 : i32
    %c0_i32_1 = arith.constant 0 : i32
    return %arg1, %c0_i32, %c0_i32_0 : i32, i32, i32
  }
  func.func @transform_18(%arg0: i32, %arg1: i32) -> (i32, i32, i32) {
    %c0_i32 = arith.constant 0 : i32
    %c0_i32_0 = arith.constant 0 : i32
    %c0_i32_1 = arith.constant 0 : i32
    return %arg1, %c0_i32, %c0_i32_0 : i32, i32, i32
  }
  func.func @transform_19(%arg0: i32, %arg1: i32) -> (i32, i32, i32) {
    %c0_i32 = arith.constant 0 : i32
    %c0_i32_0 = arith.constant 0 : i32
    %c0_i32_1 = arith.constant 0 : i32
    return %arg1, %c0_i32, %c0_i32_0 : i32, i32, i32
  }
  func.func @transform_20(%arg0: i32, %arg1: i32) -> (i32, i32, i32) {
    %c0_i32 = arith.constant 0 : i32
    %c0_i32_0 = arith.constant 0 : i32
    %c0_i32_1 = arith.constant 0 : i32
    return %arg1, %c0_i32, %c0_i32_0 : i32, i32, i32
  }
  func.func @transform_21(%arg0: i32, %arg1: i32) -> (i32, i32, i32) {
    %c0_i32 = arith.constant 0 : i32
    %c0_i32_0 = arith.constant 0 : i32
    %c0_i32_1 = arith.constant 0 : i32
    return %arg0, %c0_i32, %c0_i32_0 : i32, i32, i32
  }
}

</mosaic_0001>

<bundles_post_ra>
// kernel: _lambda_.1
= control target key start
LH: loop header
LB: loop body
LE: loop exit
PB: predicated region body
PF: predicated region fallthrough
CT: control target
= control target key end

     0   :  { %s4195_s0 = inlined_call_operand.vmem [shape: f32[4,8,128], index: 0, kind: input, shape index: {}]   ;;  %s4196_s1 = inlined_call_operand.vmem [shape: f32[1,8,128], index: 1, kind: input, shape index: {}]   ;;  %s4197_s2 = inlined_call_operand.vmem [shape: f32[2,1,128], index: 2, kind: input, shape index: {}]   ;;  %s4198_s3 = inlined_call_operand.vmem [shape: f32[2,1,128], index: 3, kind: input, shape index: {}]   ;;  %s4199_s4 = inlined_call_operand.vmem [shape: bf16[2,1,128,128], index: 4, kind: input, shape index: {}]   ;;  %s4200_s5 = inlined_call_operand.vmem [shape: bf16[2,1,128,128], index: 5, kind: input, shape index: {}]   ;;  %s4201_s6 = inlined_call_operand.vmem [shape: bf16[2,1,128,128], index: 6, kind: input, shape index: {}]   ;;  %s4202_s7 = inlined_call_operand.vmem [shape: bf16[2,1,128,128], index: 7, kind: input, shape index: {}]   ;;  %s4203_s8 = inlined_call_operand.vmem [shape: f32[2,1,128], index: 8, kind: input, shape index: {}]   ;;  %s4204_s9 = inlined_call_operand.vmem [shape: f32[2,1,128], index: 9, kind: input, shape index: {}]   ;;  %s4205_s10 = inlined_call_operand.vmem [shape: f32[2,1,128], index: 10, kind: input, shape index: {}]   ;;  %s4206_s11 = inlined_call_operand.vmem [shape: bf16[2,128,512], index: 11, kind: input, shape index: {}]   ;;  %s4207_s12 = inlined_call_operand.vmem [shape: f32[2,1,512], index: 12, kind: input, shape index: {}]   ;;  %s4208_s13 = inlined_call_operand.vmem [shape: bf16[2,512,128], index: 13, kind: input, shape index: {}]   ;;  %s4209_s14 = inlined_call_operand.vmem [shape: f32[2,1,128], index: 14, kind: input, shape index: {}]   ;;  %s4210_s15 = inlined_call_operand.vmem [shape: f32[2,1,128], index: 15, kind: input, shape index: {}]   ;;  %s4211_s16 = inlined_call_operand.vmem [shape: f32[2,1,128], index: 16, kind: input, shape index: {}]   ;;  %s4212_s17 = inlined_call_operand.vmem [shape: bf16[2,128,16], index: 17, kind: input, shape index: {}]   ;;  %s4213_s18 = inlined_call_operand.vmem [shape: f32[2,1,16], index: 18, kind: input, shape index: {}]   ;;  %s4214_s19 = inlined_call_operand.vmem [shape: bf16[2,16,128], index: 19, kind: input, shape index: {}]   ;;  %s4215_s20 = inlined_call_operand.vmem [shape: f32[2,1,128], index: 20, kind: input, shape index: {}]   ;;  %s4216_s21 = inlined_call_operand.hbm [shape: f32[4,8,128], index: 21, kind: output, shape index: {}]  }
   0x1   :  { %4232 = sst [smem:[#allocation20_spill]] %s4195_s0 }
   0x2   :  { %4233 = sst [smem:[#allocation21_spill]] %s4196_s1 }
   0x3   :  { %4234 = sst [smem:[#allocation22_spill]] %s4197_s2 }
   0x4   :  { %4235 = sst [smem:[#allocation23_spill]] %s4198_s3 }
   0x5   :  { %4236 = sst [smem:[#allocation24_spill]] %s4199_s4 }
   0x6   :  { %4237 = sst [smem:[#allocation25_spill]] %s4200_s5 }
   0x7   :  { %4238 = sst [smem:[#allocation26_spill]] %s4201_s6 }
   0x8   :  { %4239 = sst [smem:[#allocation27_spill]] %s4202_s7 }
   0x9   :  { %4240 = sst [smem:[#allocation28_spill]] %s4203_s8 }
   0xa   :  { %4241 = sst [smem:[#allocation29_spill]] %s4204_s9 }
   0xb   :  { %4242 = sst [smem:[#allocation30_spill]] %s4205_s10 }
   0xc   :  { %4243 = sst [smem:[#allocation31_spill]] %s4206_s11 }
   0xd   :  { %4244 = sst [smem:[#allocation32_spill]] %s4207_s12 }
   0xe   :  { %4245 = sst [smem:[#allocation33_spill]] %s4208_s13 }
   0xf   :  { %4246 = sst [smem:[#allocation34_spill]] %s4209_s14 }
  0x10   :  { %4247 = sst [smem:[#allocation35_spill]] %s4211_s16 }
  0x11   :  { %4248 = sst [smem:[#allocation36_spill]] %s4212_s17 }
  0x12   :  { %4249 = sst [smem:[#allocation37_spill]] %s4213_s18 }
  0x13   :  { %4250 = sst [smem:[#allocation38_spill]] %s4214_s19 }
  0x14   :  { %4251 = sst [smem:[#allocation39_spill]] %s4215_s20 }
  0x15   :  { %4252 = sst [smem:[#allocation40_spill]] %s4216_s21 }
  0x16   :  { %26 = vsyncpa [#allocation4], 0 }
  0x17   :  { %28 = vsyncpa [#allocation4 + $0x1], 0  ;;  %s3700_s2 = smov 0   ;;  %s3702_s25 = smov 0  }
  0x18   :  { %s3704_s26 = smov 0   ;;  %s3706_s27 = smov 0  }
  0x19   :  { %s3708_s3 = smov 0   ;;  %s3710_s28 = smov 0  }
  0x1a   :  { %s3712_s29 = smov 0   ;;  %s3714_s0 = smov 0  }
  0x1b LB: > { %4253 = sst [smem:[#allocation6_spill]] %s3555_s2  ;;  %s2880_s4 = sadd.s32 4294967295, %s3583_s0   ;;  %s3583_s0 = sphi %s3714_s0, %s34_s0   ;;  %s3579_s29 = sphi %s3712_s29, %s4322_s29   ;;  %s3575_s28 = sphi %s3710_s28, %s4321_s28   ;;  %s3571_s3 = sphi %s3708_s3, %s4320_s3   ;;  %s3567_s27 = sphi %s3706_s27, %s4319_s27   ;;  %s3563_s26 = sphi %s3704_s26, %s4318_s26   ;;  %s3559_s25 = sphi %s3702_s25, %s4317_s25   ;;  %s3555_s2 = sphi %s3700_s2, %s4316_s2  }
  0x1c   : > { %4254 = sst [smem:[#allocation7_spill]] %s3559_s25  ;;  %s2881_s30 = sadd.s32 4294967294, %s3583_s0  }
  0x1d   : > { %4255 = sst [smem:[#allocation8_spill]] %s3563_s26  ;;  %s43_s5 = sadd.s32 1, %s3575_s28 }
  0x1e   : > { %4256 = sst [smem:[#allocation9_spill]] %s3567_s27  ;;  %p44_p0 = scmp.ge.s32.totalorder %s43_s5, 2 }
  0x1f   : > { %4257 = sst [smem:[#allocation10_spill]] %s3571_s3  ;;  %s46_s22 = sadd.s32 1, %s3579_s29 }
  0x20   : > { %4258 = sst [smem:[#allocation11_spill]] %s3575_s28  ;;  %p604_p1 = scmp.ne.s32.totalorder %s3563_s26, %s3559_s25 }
  0x21   : > { %4259 = sst [smem:[#allocation12_spill]] %s3579_s29  ;;  %p605_p2 = scmp.eq.s32.totalorder %s2880_s4, 7 }
  0x22   : > { %4260 = sst [smem:[#allocation13_spill]] %s3583_s0  ;;  %s4324_s5 = smov (%p44_p0, %s43_s5), 0 }
  0x23   : > { %4261 = sst [smem:[#allocation14_spill]] %s4324_s5  ;;  %s4326_s22 = smov (!%p44_p0, %s46_s22), %s3579_s29 }
  0x24   : > { %p3749_p3 = por %p605_p2, %p604_p1  ;;  %p610_p4 = scmp.ne.s32.totalorder %s3559_s25, %s3555_s2 }
  0x25   : > { %p48_p5 = scmp.ge.s32.totalorder %s4326_s22, 4  ;;  %p611_p6 = scmp.eq.s32.totalorder %s2881_s30, 7 }
  0x26   : > { %s4262_s23 = scalar_select %p3749_p3, 1, 0 }
  0x27   : > { %p2884_p7 = scmp.ge.s32.totalorder %s3583_s0, 1  ;;  %p770_p8 = scmp.lt.s32.totalorder %s3583_s0, 9 }
  0x28   : > { %4263 = sst [smem:[#allocation15_spill]] %s4262_s23  ;;  %s4328_s22 = smov (%p48_p5, %s4326_s22), 0 }
  0x29   : > { %4264 = sst [smem:[#allocation16_spill]] %s4328_s22  ;;  %p3759_p9 = por %p611_p6, %p610_p4 }
  0x2a   : > { %p771_p10 = pnand %p2884_p7, %p770_p8  ;;  %s591_s24 = ssub.s32 %s3579_s29, %s4328_s22 }
  0x2b   : > { %s4265_s1 = scalar_select %p3759_p9, 1, 0 }
  0x2c   : > { %s594_s4 = sadd.s32 1, %s3563_s26  ;;  %p592_p11 = scmp.eq.s32.totalorder %s591_s24, 0 }
  0x2d   : > { %4266 = sst [smem:[#allocation17_spill]] %s4265_s1  ;;  %774 = sbr.rel (%p771_p10) target bundleno = 3219 (0xc93), region = 104 }
  0x2e   : > { %s3767_s5 = scalar_select %p592_p11, %s3563_s26, %s594_s4  }
  0x30   : > { %4267 = sst [smem:[#allocation18_spill]] %s3767_s5 }
  0x32   : > { %s4223_s30 = sand.u32 1, %s3559_s25   ;;  %p903_p12 = scmp.lt.s32.totalorder %s3571_s3, 3 }
  0x33   : > { %s3773_s28 = sshll.u32 %s4223_s30, 3  ;;  %p907_p13 = scmp.lt.s32.totalorder %s3567_s27, 1 }
  0x34   : > { %s904_s1 = scalar_select %p903_p12, %s3571_s3, 3 }
  0x35   : > { %s3778_s2 = scalar_select %p907_p13, %s3567_s27, 1 }
  0x36   : > { %s2886_s24 = sshll.u32 %s904_s1, 3  ;;  %s4268_s29 = sld [smem:[#allocation20_spill]] }
  0x37   : > { %s3032_s20 = sshll.u32 %s3778_s2, 6  ;;  %s4271_s17 = sld [smem:[#allocation24_spill]] }
  0x38   : > { %s4273_s6 = sld [smem:[#allocation26_spill]]  ;;  %s3036_s27 = sshll.u32 %s3778_s2, 8 }
  0x39   : > { %s4274_s7 = sld [smem:[#allocation27_spill]]  ;;  %s2897_s23 = sshll.u32 %s3778_s2, 2 }
  0x3a   : > { %s4278_s11 = sld [smem:[#allocation31_spill]] }
  0x3b   : > { %s4279_s12 = sld [smem:[#allocation32_spill]] }
  0x3c   : > { %s906_s5 = scalar_lea.vmem %s4268_s29, %s2886_s24  ;;  %s4272_s29 = sld [smem:[#allocation25_spill]] }
  0x3d   : > { %s3795_s1 = scalar_lea.vmem %s4271_s17, %s3032_s20  ;;  %s4281_s13 = sld [smem:[#allocation33_spill]] }
  0x3e   : > { %s3805_s25 = scalar_lea.vmem %s4273_s6, %s3032_s20  ;;  %s4283_s9 = sld [smem:[#allocation35_spill]] }
  0x3f   : > { %s3810_s30 = scalar_lea.vmem %s4274_s7, %s3032_s20  ;;  %s4284_s18 = sld [smem:[#allocation36_spill]] }
  0x40   : > { %s3828_s3 = scalar_lea.vmem %s4278_s11, %s3036_s27  ;;  %s4285_s16 = sld [smem:[#allocation37_spill]] }
  0x41   : > { %s3834_s17 = scalar_lea.vmem %s4279_s12, %s2897_s23  ;;  %s4286_s26 = sld [smem:[#allocation38_spill]] }
  0x42   : > { %s3800_s24 = scalar_lea.vmem %s4272_s29, %s3032_s20  ;;  %4280 = sst [smem:[#allocation19_spill]] %s3834_s17 }
  0x43   : > { %s3839_s4 = scalar_lea.vmem %s4281_s13, %s3036_s27  ;;  %s3039_s17 = sshll.u32 %s3778_s2, 3 }
  0x44   : > { %s964_s8 = scalar_lea.vmem %s4283_s9, %s3778_s2  ;;  %s4287_s6 = sld [smem:[#allocation39_spill]] }
  0x45   : > { %s3856_s12 = scalar_lea.vmem %s4284_s18, %s3032_s20  ;;  %s902_s9 = scalar_lea.vmem [#allocation3], %s3773_s28 }
  0x46   : > { %s972_s13 = scalar_lea.vmem %s4285_s16, %s3778_s2  ;;  %s4288_s21 = sld [smem:[#allocation9_spill]] }
  0x47   : > { %s3866_s14 = scalar_lea.vmem %s4286_s26, %s3039_s17 }
  0x4a   : > { %s980_s11 = scalar_lea.vmem %s4287_s6, %s3778_s2 }
  0x4c   : > { %p2904_p0 = scmp.ne.s32.totalorder %s4288_s21, 0 }
  0x4e   : > { %985 = sbr.rel (%p2904_p0) target bundleno = 85 (0x55), region = 108 }
  0x53   : > { %v986_v0 = vld [vmem:[%s906_s5] sm:$0xff] }
  0x54   : > { %987 = vst [vmem:[#allocation2] sm:$0xff] %v986_v0 }
  0x55 PF: > { %s4289_s23 = sld [smem:[#allocation21_spill]]  ;;  %v3585_v4 = vmov 0.0   ;;  %v3344_v6 = vld [vmem:[%s3795_s1 + $0x38] sm:$0xff]   ;;  %v3346_v8 = vld [vmem:[%s3795_s1 + $0x30] sm:$0xff]   ;;  %v3348_v10 = vld [vmem:[%s3795_s1 + $0x28] sm:$0xff]   ;;  %vm3586_vm0 = vmmov 0  }
  0x56   : > { %3139 = vmatprep.subr.bf16.mxu0 %v3585_v4  ;;  %3159 = vmatprep.subr.bf16.mxu1 %v3585_v4  ;;  %v3345_v7 = vld [vmem:[%s3800_s24 + $0x38] sm:$0xff]   ;;  %v3347_v9 = vld [vmem:[%s3800_s24 + $0x30] sm:$0xff]   ;;  %v3349_v11 = vld [vmem:[%s3800_s24 + $0x28] sm:$0xff]   ;;  %s4292_s18 = sld [smem:[#allocation23_spill]]  ;;  %vm1345_vm1 = vcmask 523264   ;;  %s3587_s27 = smov 64  }
  0x57   : > { %3140 = vmatpush3.bf16.msra.mxu0 %v3344_v6  ;;  %3160 = vmatpush3.bf16.msra.mxu1 %v3345_v7  ;;  %v3350_v12 = vld [vmem:[%s3795_s1 + $0x20] sm:$0xff]   ;;  %v3352_v14 = vld [vmem:[%s3795_s1 + $0x18] sm:$0xff]   ;;  %v3354_v16 = vld [vmem:[%s3795_s1 + $0x10] sm:$0xff]   ;;  %vm1408_vm2 = vcmask 1043456   ;;  %vm1392_vm3 = vcmask 64512   ;;  %s4294_s16 = sld [smem:[#allocation28_spill]] }
  0x58   : > { %3141 = vmatprep.subr.bf16.mxu0 %v3585_v4  ;;  %3161 = vmatprep.subr.bf16.mxu1 %v3585_v4  ;;  %v3351_v13 = vld [vmem:[%s3800_s24 + $0x20] sm:$0xff]   ;;  %v3353_v15 = vld [vmem:[%s3800_s24 + $0x18] sm:$0xff]   ;;  %v3355_v17 = vld [vmem:[%s3800_s24 + $0x10] sm:$0xff]   ;;  %s4296_s10 = sld [smem:[#allocation29_spill]]  ;;  %vm2540_vm4 = vcmask 130048  }
  0x59   : > { %3155 = vmatprep.mubr.msk.bf16.mxu0 %vm3586_vm0, %v3585_v4  ;;  %3175 = vmatprep.mubr.msk.bf16.mxu1 %vm3586_vm0, %v3585_v4  ;;  %v3356_v18 = vld [vmem:[%s3795_s1 + $0x8] sm:$0xff]   ;;  %v3358_v20 = vld [vmem:[%s3795_s1] sm:$0xff]   ;;  %v3360_v36 = vld [vmem:[%s3805_s25 + $0x38] sm:$0xff]   ;;  %s4298_s7 = sld [smem:[#allocation30_spill]] }
  0x5a   : > { %v3357_v19 = vld [vmem:[%s3800_s24 + $0x8] sm:$0xff]   ;;  %v3359_v21 = vld [vmem:[%s3800_s24] sm:$0xff]   ;;  %s4290_s24 = sld [smem:[#allocation22_spill]]  ;;  %v3361_v38 = vld [vmem:[%s3805_s25 + $0x30] sm:$0xff]  }
  0x5b   : > { %v988_v1 = vld [vmem:[#allocation2] sm:$0xff]  ;;  %3142 = vmatpush3.bf16.msra.mxu0 %v3346_v8  ;;  %3162 = vmatpush3.bf16.msra.mxu1 %v3347_v9  ;;  %v3362_v39 = vld [vmem:[%s3805_s25 + $0x28] sm:$0xff]   ;;  %v3364_v41 = vld [vmem:[%s3805_s25 + $0x18] sm:$0xff]   ;;  %s4300_s5 = sld [smem:[#allocation19_spill]] }
  0x5c   : > { %v989_v2 = vld [vmem:[%s4289_s23] sm:$0xff]  ;;  %3143 = vmatprep.subr.bf16.mxu0 %v3585_v4  ;;  %3163 = vmatprep.subr.bf16.mxu1 %v3585_v4  ;;  %s4293_s19 = scalar_lea.vmem %s4292_s18, %s3778_s2  ;;  %v3365_v42 = vld [vmem:[%s3805_s25 + $0x10] sm:$0xff]   ;;  %v3366_v43 = vld [vmem:[%s3805_s25 + $0x8] sm:$0xff]  }
  0x5d   : > { %v3877_v3 = vadd.f32 %v989_v2, %v988_v1  ;;  %v2906_v33 = vld [vmem:[%s4293_s19] ss:$0 sm:$0xff]  ;;  %s4295_s22 = scalar_lea.vmem %s4294_s16, %s3778_s2 }
  0x5e   : > { %v3363_v40 = vld [vmem:[%s3805_s25 + $0x20] sm:$0xff]   ;;  %s4297_s0 = scalar_lea.vmem %s4296_s10, %s3778_s2 }
  0x5f   : > { %993 = vadd.xlane.f32.xlu0 %v3877_v3  ;;  %v997_v5 = vmul.f32 %v3877_v3, %v3877_v3  ;;  %3144 = vmatpush3.bf16.msra.mxu0 %v3348_v10  ;;  %v3367_v44 = vld [vmem:[%s3805_s25] sm:$0xff]   ;;  %s4299_s23 = scalar_lea.vmem %s4298_s7, %s3778_s2 }
  0x60   : > { %3164 = vmatpush3.bf16.msra.mxu1 %v3349_v11  ;;  %3145 = vmatprep.subr.bf16.mxu0 %v3585_v4  ;;  %s4291_s17 = scalar_lea.vmem %s4290_s24, %s3778_s2  ;;  %s4301_s24 = sld [smem:[#allocation34_spill]] }
  0x61   : > { %3165 = vmatprep.subr.bf16.mxu1 %v3585_v4  ;;  %v2905_v31 = vld [vmem:[%s4291_s17] ss:$0 sm:$0xff] }
  0x63   : > { %998 = vadd.xlane.f32.xlu0 %v997_v5  ;;  %3146 = vmatpush3.bf16.msra.mxu0 %v3350_v12 }
  0x64   : > { %3166 = vmatpush3.bf16.msra.mxu1 %v3351_v13  ;;  %3147 = vmatprep.subr.bf16.mxu0 %v3585_v4 }
  0x65   : > { %3167 = vmatprep.subr.bf16.mxu1 %v3585_v4 }
  0x66   : > { %s4302_s17 = scalar_lea.vmem %s4301_s24, %s3778_s2 }
  0x67   : > { %3148 = vmatpush3.bf16.msra.mxu0 %v3352_v14 }
  0x68   : > { %3168 = vmatpush3.bf16.msra.mxu1 %v3353_v15  ;;  %3149 = vmatprep.subr.bf16.mxu0 %v3585_v4 }
  0x69   : > { %3169 = vmatprep.subr.bf16.mxu1 %v3585_v4 }
  0x6b   : > { %3150 = vmatpush3.bf16.msra.mxu0 %v3354_v16 }
  0x6c   : > { %3170 = vmatpush3.bf16.msra.mxu1 %v3355_v17  ;;  %3151 = vmatprep.subr.bf16.mxu0 %v3585_v4 }
  0x6d   : > { %3171 = vmatprep.subr.bf16.mxu1 %v3585_v4 }
  0x6f   : > { %3152 = vmatpush3.bf16.msra.mxu0 %v3356_v18 }
  0x70   : > { %3172 = vmatpush3.bf16.msra.mxu1 %v3357_v19  ;;  %3153 = vmatprep.subr.bf16.mxu0 %v3585_v4 }
  0x71   : > { %3173 = vmatprep.subr.bf16.mxu1 %v3585_v4 }
  0x73   : > { %3154 = vmatpush3.bf16.msra.mxu0 %v3358_v20 }
  0x74   : > { %3174 = vmatpush3.bf16.msra.mxu1 %v3359_v21  ;;  %3179 = vmatprep.subr.bf16.mxu0 %v3585_v4 }
  0x75   : > { %3199 = vmatprep.subr.bf16.mxu1 %v3585_v4 }
  0xe8   : > { %v994_v22 = vpop.xlane.xlu0 %993 }
  0xe9   : > { %v996_v23 = vmul.f32 0.0078125, %v994_v22 }
  0xeb   : > { %v1001_v25 = vmul.f32 %v996_v23, %v996_v23  ;;  %v1003_v29 = vsub.f32 %v3877_v3, %v996_v23 }
  0xec   : > { %v999_v24 = vpop.xlane.xlu0 %998 }
  0xed   : > { %v1000_v26 = vmul.f32 0.0078125, %v999_v24 }
  0xef   : > { %v1002_v27 = vsub.f32 %v1000_v26, %v1001_v25 }
  0xf1   : > { %v1004_v28 = vadd.f32 1e-05, %v1002_v27 }
  0xf3   : > { %3465 = vrsqrt.f32 %v1004_v28 }
 0x100   : > { %v3466_v30 = vpop.eup %3465 }
 0x101   : > { %v1006_v32 = vmul.f32 %v3466_v30, %v1003_v29 }
 0x103   : > { %v1013_v34 = vmul.f32 %v2905_v31, %v1006_v32 }
 0x105   : > { %v1020_v35 = vadd.f32 %v2906_v33, %v1013_v34 }
 0x107   : > { %v1021_v37 = vpack.c.bf16 %v1020_v35, %v1020_v35 }
 0x109   : > { %3156 = vmatmul.mubr.bf16.vlgmr.msra.gmra.mxu0 %v1021_v37  ;;  %3176 = vmatmul.mubr.bf16.vlgmr.msra.gmra.mxu1 %v1021_v37 }
 0x10a   : > { %3180 = vmatpush3.bf16.msra.mxu0 %v3360_v36  ;;  %3195 = vmatprep.mubr.msk.bf16.mxu0 %vm3586_vm0, %v3585_v4 }
 0x10b   : > { %3181 = vmatprep.subr.bf16.mxu0 %v3585_v4  ;;  %3201 = vmatprep.mubr.msk.bf16.mxu1 %vm3586_vm0, %v3585_v4 }
 0x10e   : > { %3182 = vmatpush3.bf16.msra.mxu0 %v3361_v38  ;;  %v3368_v38 = vld [vmem:[%s3810_s30 + $0x38] sm:$0xff]  }
 0x10f   : > { %3183 = vmatprep.subr.bf16.mxu0 %v3585_v4 }
 0x112   : > { %3184 = vmatpush3.bf16.msra.mxu0 %v3362_v39  ;;  %v3369_v39 = vld [vmem:[%s3810_s30 + $0x30] sm:$0xff]  }
 0x113   : > { %3185 = vmatprep.subr.bf16.mxu0 %v3585_v4 }
 0x116   : > { %3186 = vmatpush3.bf16.msra.mxu0 %v3363_v40  ;;  %v3370_v40 = vld [vmem:[%s3810_s30 + $0x28] sm:$0xff]  }
 0x117   : > { %3187 = vmatprep.subr.bf16.mxu0 %v3585_v4 }
 0x11a   : > { %3188 = vmatpush3.bf16.msra.mxu0 %v3364_v41  ;;  %v3371_v41 = vld [vmem:[%s3810_s30 + $0x20] sm:$0xff]  }
 0x11b   : > { %3189 = vmatprep.subr.bf16.mxu0 %v3585_v4 }
 0x11e   : > { %3190 = vmatpush3.bf16.msra.mxu0 %v3365_v42  ;;  %v3372_v42 = vld [vmem:[%s3810_s30 + $0x18] sm:$0xff]  }
 0x11f   : > { %3191 = vmatprep.subr.bf16.mxu0 %v3585_v4 }
 0x122   : > { %3192 = vmatpush3.bf16.msra.mxu0 %v3366_v43  ;;  %v3373_v43 = vld [vmem:[%s3810_s30 + $0x10] sm:$0xff]  }
 0x123   : > { %3193 = vmatprep.subr.bf16.mxu0 %v3585_v4 }
 0x126   : > { %3194 = vmatpush3.bf16.msra.mxu0 %v3367_v44  ;;  %v3374_v44 = vld [vmem:[%s3810_s30 + $0x8] sm:$0xff]  }
 0x127   : > { %3223 = vmatprep.subr.bf16.mxu0 %v3585_v4 }
 0x129   : > { %3196 = vmatmul.mubr.bf16.vlgmr.msra.gmra.mxu0 %v1021_v37 }
 0x12a   : > { %3239 = vmatprep.mubr.msk.bf16.mxu0 %vm3586_vm0, %v3585_v4  ;;  %3224 = vmatpush3.bf16.msra.mxu0 %v3368_v38 }
 0x12b   : > { %3225 = vmatprep.subr.bf16.mxu0 %v3585_v4 }
 0x12e   : > { %3226 = vmatpush3.bf16.msra.mxu0 %v3369_v39 }
 0x12f   : > { %3227 = vmatprep.subr.bf16.mxu0 %v3585_v4 }
 0x132   : > { %3228 = vmatpush3.bf16.msra.mxu0 %v3370_v40 }
 0x133   : > { %3229 = vmatprep.subr.bf16.mxu0 %v3585_v4 }
 0x136   : > { %3230 = vmatpush3.bf16.msra.mxu0 %v3371_v41 }
 0x137   : > { %3231 = vmatprep.subr.bf16.mxu0 %v3585_v4 }
 0x13a   : > { %3232 = vmatpush3.bf16.msra.mxu0 %v3372_v42 }
 0x13b   : > { %3233 = vmatprep.subr.bf16.mxu0 %v3585_v4 }
 0x13e   : > { %3234 = vmatpush3.bf16.msra.mxu0 %v3373_v43  ;;  %v2944_v43 = vld [vmem:[%s4297_s0] ss:$0 sm:$0xff] }
 0x13f   : > { %3235 = vmatprep.subr.bf16.mxu0 %v3585_v4 }
 0x142   : > { %3236 = vmatpush3.bf16.msra.mxu0 %v3374_v44 }
 0x143   : > { %3237 = vmatprep.subr.bf16.mxu0 %v3585_v4 }
 0x1c9   : > { %v1127_v45 = vpop.f32.mrf.mxu0  ;;  %v1232_v46 = vpop.f32.mrf.mxu1 }
 0x1ca   : > { %v1343_v47 = vpack.c.bf16 %v1232_v46, %v1232_v46  ;;  %v1133_v53 = vmul.f32 0.125, %v1127_v45  ;;  %v3375_v45 = vld [vmem:[%s3810_s30] sm:$0xff]  }
 0x1cb   : > { %v3157_v48 = vpop.f32.mrf.mxu0  ;;  %v3177_v49 = vpop.f32.mrf.mxu1  ;;  %3238 = vmatpush3.bf16.msra.mxu0 %v3375_v45  ;;  %v2945_v45 = vld [vmem:[%s4299_s23] ss:$0 sm:$0xff] }
 0x1cc   : > { %v1350_v50 = vsel %vm1345_vm1, %v1343_v47, 0  ;;  %1457 = vrot.lane.b32.xlu0 %v1343_v47, %s3587_s27  ;;  %v1342_v56 = vpack.c.bf16 %v1133_v53, %v1133_v53 }
 0x1cd   : > { %v1130_v51 = vpop.f32.mrf.mxu0  ;;  %v1235_v52 = vpop.f32.mrf.mxu1  ;;  %3200 = vmatpush3.bf16.xpose.msra.mxu1 %v1350_v50 }
 0x1ce   : > { %3205 = vmatprep.subr.bf16.mxu1 %v3585_v4 }
 0x1cf   : > { %v3158_v54 = vpop.f32.mrf.mxu0  ;;  %v3178_v55 = vpop.f32.mrf.mxu1 }
 0x1d0   : > { %v3376_v54 = vld [vmem:[%s3828_s3 + $0xe0] ss:$16 sps:$4 sm:$0xff]   ;;  %v3378_v55 = vld [vmem:[%s3828_s3 + $0xe4] ss:$16 sps:$4 sm:$0xff]  }
 0x1d4   : > { %3202 = vmatmul.mubr.msk.bf16.vlgmr.msra.gmra.mxu1 %vm1345_vm1, %v1342_v56 }
 0x1d5   : > { %3207 = vmatprep.mubr.msk.bf16.mxu1 %vm3586_vm0, %v3585_v4 }
 0x1e9   : > { %v1336_v57 = vpop.f32.mrf.mxu0 }
 0x1ea   : > { %v1344_v58 = vpack.c.bf16 %v1336_v57, %v1336_v57  ;;  %v3381_v57 = vld [vmem:[%s3828_s3 + $0xec] ss:$16 sps:$4 sm:$0xff]  }
 0x1eb   : > { %v3197_v59 = vpop.f32.mrf.mxu0  ;;  %1965 = vmatprep.subr.bf16.mxu0 %v3381_v57  ;;  %v3434_v57 = vld [vmem:[%s3839_s4 + $0x28] sm:$0xff]  }
 0x1ec   : > { %v1410_v60 = vsel %vm1408_vm2, %v1344_v58, 0 }
 0x1ed   : > { %v1339_v61 = vpop.f32.mrf.mxu0  ;;  %3206 = vmatpush3.bf16.msra.mxu1 %v1410_v60 }
 0x1ee   : > { %3211 = vmatprep.subr.bf16.mxu1 %v3585_v4 }
 0x1ef   : > { %v3198_v62 = vpop.f32.mrf.mxu0 }
 0x23e   : > { %v1458_v14 = vpop.permute.xlu0 %1457 }
 0x23f   : > { %v1463_v16 = vsel %vm1345_vm1, %v1458_v14, 0  ;;  %v3399_v14 = vld [vmem:[%s3828_s3 + $0x8c] ss:$16 sps:$4 sm:$0xff]  }
 0x294   : > { %v1386_v63 = vpop.f32.mrf.mxu1 }
 0x295   : > { %v1393_v0 = vsel %vm1392_vm3, %v1386_v63, -inf }
 0x296   : > { %1394 = vmax.xlane.f32.xlu1 %v1393_v0  ;;  %v3203_v1 = vpop.f32.mrf.mxu1 }
 0x298   : > { %v1389_v2 = vpop.f32.mrf.mxu1 }
 0x299   : > { %v3384_v2 = vld [vmem:[%s3828_s3 + $0xc4] ss:$16 sps:$4 sm:$0xff]  }
 0x29a   : > { %v3204_v5 = vpop.f32.mrf.mxu1 }
 0x29b   : > { %v3387_v5 = vld [vmem:[%s3828_s3 + $0xcc] ss:$16 sps:$4 sm:$0xff]  }
 0x31f   : > { %v1395_v6 = vpop.xlane.xlu1 %1394 }
 0x320   : > { %v1396_v7 = vsub.f32 %v1386_v63, %v1395_v6  ;;  %v3382_v6 = vld [vmem:[%s3828_s3 + $0xc0] ss:$16 sps:$4 sm:$0xff]  }
 0x322   : > { %v1397_v8 = vmul.f32 1.442695, %v1396_v7  ;;  %v3385_v7 = vld [vmem:[%s3828_s3 + $0xc8] ss:$16 sps:$4 sm:$0xff]  }
 0x324   : > { %3467 = vpow2.f32 %v1397_v8  ;;  %v3393_v8 = vld [vmem:[%s3828_s3 + $0xac] ss:$16 sps:$4 sm:$0xff]  }
 0x331   : > { %v3468_v9 = vpop.eup %3467 }
 0x332   : > { %v1399_v10 = vsel %vm1392_vm3, %v3468_v9, 0.0 }
 0x333   : > { %1400 = vadd.xlane.f32.xlu1 %v1399_v10  ;;  %v3391_v10 = vld [vmem:[%s3828_s3 + $0xa8] ss:$16 sps:$4 sm:$0xff]  }
 0x344   : > { %1454 = vrot.lane.b32.xlu1 %v1342_v56, %s3587_s27  ;;  %v3379_v56 = vld [vmem:[%s3828_s3 + $0xe8] ss:$16 sps:$4 sm:$0xff]  }
 0x3bc   : > { %v1401_v11 = vpop.xlane.xlu1 %1400 }
 0x3bd   : > { %3469 = vrcp.f32 %v1401_v11  ;;  %v3394_v11 = vld [vmem:[%s3828_s3 + $0x80] ss:$16 sps:$4 sm:$0xff]  }
 0x3c0   : > { %v1455_v17 = vpop.permute.xlu1 %1454 }
 0x3ca   : > { %v3470_v12 = vpop.eup %3469 }
 0x3cb   : > { %v1403_v13 = vmul.f32 %v3470_v12, %v3468_v9  ;;  %v3388_v9 = vld [vmem:[%s3828_s3 + $0xa0] ss:$16 sps:$4 sm:$0xff]   ;;  %v3396_v12 = vld [vmem:[%s3828_s3 + $0x84] ss:$16 sps:$4 sm:$0xff]  }
 0x3cd   : > { %v1404_v15 = vpack.c.bf16 %v1403_v13, %v1403_v13  ;;  %v3397_v13 = vld [vmem:[%s3828_s3 + $0x88] ss:$16 sps:$4 sm:$0xff]  }
 0x3cf   : > { %3208 = vmatmul.mubr.msk.bf16.vlgmr.msra.gmra.mxu1 %vm1392_vm3, %v1404_v15  ;;  %v3402_v15 = vld [vmem:[%s3828_s3 + $0x64] ss:$16 sps:$4 sm:$0xff]  }
 0x3d0   : > { %3212 = vmatpush3.bf16.xpose.msra.mxu1 %v1463_v16  ;;  %3213 = vmatprep.mubr.msk.bf16.mxu1 %vm3586_vm0, %v3585_v4  ;;  %v3405_v16 = vld [vmem:[%s3828_s3 + $0x6c] ss:$16 sps:$4 sm:$0xff]  }
 0x3d1   : > { %3217 = vmatprep.subr.bf16.mxu1 %v3585_v4 }
 0x3d7   : > { %3214 = vmatmul.mubr.msk.bf16.vlgmr.msra.gmra.mxu1 %vm1345_vm1, %v1455_v17  ;;  %v3400_v17 = vld [vmem:[%s3828_s3 + $0x60] ss:$16 sps:$4 sm:$0xff]  }
 0x3d8   : > { %3219 = vmatprep.mubr.msk.bf16.mxu1 %vm3586_vm0, %v3585_v4 }
 0x48f   : > { %v1446_v18 = vpop.f32.mrf.mxu1 }
 0x490   : > { %v1452_v51 = vpack.c.bf16 %v1446_v18, %v1446_v18  ;;  %v3403_v18 = vld [vmem:[%s3828_s3 + $0x68] ss:$16 sps:$4 sm:$0xff]  }
 0x491   : > { %v3209_v19 = vpop.f32.mrf.mxu1 }
 0x492   : > { %v3408_v19 = vld [vmem:[%s3828_s3 + $0x44] ss:$16 sps:$4 sm:$0xff]  }
 0x493   : > { %v1449_v20 = vpop.f32.mrf.mxu1 }
 0x494   : > { %v3411_v20 = vld [vmem:[%s3828_s3 + $0x4c] ss:$16 sps:$4 sm:$0xff]  }
 0x495   : > { %v3210_v21 = vpop.f32.mrf.mxu1 }
 0x496   : > { %v3588_v21 = vmov 0  }
 0x497   : > { %v1499_v22 = vpop.f32.mrf.mxu1 }
 0x498   : > { %v1505_v23 = vsel %vm1392_vm3, %v1499_v22, -inf }
 0x499   : > { %1506 = vmax.xlane.f32.xlu1 %v1505_v23  ;;  %v3215_v24 = vpop.f32.mrf.mxu1  ;;  %v3409_v23 = vld [vmem:[%s3828_s3 + $0x48] ss:$16 sps:$4 sm:$0xff]  }
 0x49a   : > { %v3414_v24 = vld [vmem:[%s3828_s3 + $0x24] ss:$16 sps:$4 sm:$0xff]  }
 0x49b   : > { %v1502_v25 = vpop.f32.mrf.mxu1 }
 0x49c   : > { %v3417_v25 = vld [vmem:[%s3828_s3 + $0x2c] ss:$16 sps:$4 sm:$0xff]  }
 0x49d   : > { %v3216_v26 = vpop.f32.mrf.mxu1 }
 0x49e   : > { %v3412_v26 = vld [vmem:[%s3828_s3 + $0x20] ss:$16 sps:$4 sm:$0xff]  }
 0x522   : > { %v1507_v27 = vpop.xlane.xlu1 %1506 }
 0x523   : > { %v1508_v28 = vsub.f32 %v1499_v22, %v1507_v27  ;;  %v3406_v22 = vld [vmem:[%s3828_s3 + $0x40] ss:$16 sps:$4 sm:$0xff]   ;;  %v3415_v27 = vld [vmem:[%s3828_s3 + $0x28] ss:$16 sps:$4 sm:$0xff]  }
 0x525   : > { %v1509_v29 = vmul.f32 1.442695, %v1508_v28  ;;  %v3420_v28 = vld [vmem:[%s3828_s3 + $0x4] ss:$16 sps:$4 sm:$0xff]  }
 0x527   : > { %3471 = vpow2.f32 %v1509_v29  ;;  %v3423_v29 = vld [vmem:[%s3828_s3 + $0xc] ss:$16 sps:$4 sm:$0xff]  }
 0x534   : > { %v3472_v30 = vpop.eup %3471 }
 0x535   : > { %v1511_v31 = vsel %vm1392_vm3, %v3472_v30, 0.0 }
 0x536   : > { %1512 = vadd.xlane.f32.xlu0 %v1511_v31  ;;  %v3421_v31 = vld [vmem:[%s3828_s3 + $0x8] ss:$16 sps:$4 sm:$0xff]  }
 0x54c   : > { %1518 = vrot.lane.b32.xlu0 %v1344_v58, %s3587_s27  ;;  %v2907_v58 = vld [vmem:[%s4295_s22] ss:$0 sm:$0xff]  ;;  %s4307_s22 = sld [smem:[#allocation9_spill]] }
 0x552   : > { %p3027_p1 = scmp.ne.s32.totalorder %s4307_s22, 1 }
 0x5bf   : > { %v1513_v32 = vpop.xlane.xlu0 %1512 }
 0x5c0   : > { %3473 = vrcp.f32 %v1513_v32  ;;  %v3424_v32 = vld [vmem:[%s3839_s4 + $0x78] sm:$0xff]  }
 0x5c3   : > { %v1519_v33 = vpop.permute.xlu0 %1518 }
 0x5c4   : > { %v1524_v34 = vsel %vm1408_vm2, %v1519_v33, 0  ;;  %v3425_v33 = vld [vmem:[%s3839_s4 + $0xf8] sm:$0xff]  }
 0x5c5   : > { %3218 = vmatpush3.bf16.msra.mxu1 %v1524_v34 }
 0x5c6   : > { %1924 = vmatprep.subr.bf16.mxu1 %v3378_v55  ;;  %v3432_v55 = vld [vmem:[%s3839_s4 + $0x68] sm:$0xff]  }
 0x5cd   : > { %v3474_v35 = vpop.eup %3473 }
 0x5ce   : > { %v1515_v36 = vmul.f32 %v3474_v35, %v3472_v30  ;;  %v3418_v30 = vld [vmem:[%s3828_s3] ss:$16 sps:$4 sm:$0xff]  }
 0x5d0   : > { %v1516_v37 = vpack.c.bf16 %v1515_v36, %v1515_v36 }
 0x5d2   : > { %3220 = vmatmul.mubr.msk.bf16.vlgmr.msra.gmra.mxu1 %vm1392_vm3, %v1516_v37 }
 0x5d3   : > { %1925 = vmatpush1.bf16.msra.mxu1 %v3376_v54  ;;  %1956 = vmatprep.mubr.bf16.mxu1 %v3588_v21  ;;  %v3431_v54 = vld [vmem:[%s3839_s4 + $0xb0] sm:$0xff]  }
 0x5d4   : > { %1926 = vmatprep.subr.bf16.mxu1 %v3384_v2  ;;  %v3442_v2 = vld [vmem:[%s3839_s4 + $0x18] sm:$0xff]  }
 0x5d7   : > { %1927 = vmatpush1.bf16.msra.mxu1 %v3382_v6  ;;  %v3444_v6 = vld [vmem:[%s3839_s4 + $0x50] sm:$0xff]  }
 0x692   : > { %v1560_v46 = vpop.f32.mrf.mxu1 }
 0x693   : > { %v1566_v47 = vpack.c.bf16 %v1560_v46, %v1560_v46 }
 0x694   : > { %v3221_v48 = vpop.f32.mrf.mxu1 }
 0x695   : > { %1568 = vrot.lane.b32.xlu1 %v1566_v47, %s3587_s27  ;;  %v3426_v48 = vld [vmem:[%s3839_s4 + $0x38] sm:$0xff]  }
 0x696   : > { %v1563_v49 = vpop.f32.mrf.mxu1 }
 0x697   : > { %v3427_v49 = vld [vmem:[%s3839_s4 + $0xb8] sm:$0xff]  }
 0x698   : > { %v3222_v50 = vpop.f32.mrf.mxu1 }
 0x707   : > { %v1569_v52 = vpop.permute.xlu1 %1568 }
 0x708   : > { %v1572_v53 = vsel %vm1345_vm1, %v1452_v51, %v1569_v52  ;;  %v3428_v51 = vld [vmem:[%s3839_s4 + $0x70] sm:$0xff]  }
 0x709   : > { %3240 = vmatmul.mubr.bf16.vlgmr.msra.gmra.mxu0 %v1572_v53  ;;  %v3429_v52 = vld [vmem:[%s3839_s4 + $0xf0] sm:$0xff]  }
 0x70a   : > { %1966 = vmatpush1.bf16.msra.mxu0 %v3379_v56  ;;  %1997 = vmatprep.mubr.bf16.mxu0 %v3588_v21  ;;  %v3430_v53 = vld [vmem:[%s3839_s4 + $0x30] sm:$0xff]   ;;  %v3433_v56 = vld [vmem:[%s3839_s4 + $0xe8] sm:$0xff]   ;;  %v1742_v21 = vld [vmem:[%s4300_s5] sm:$0xf] }
 0x70b   : > { %1967 = vmatprep.subr.bf16.mxu0 %v3387_v5  ;;  %v3443_v5 = vld [vmem:[%s3839_s4 + $0x98] sm:$0xff]  }
 0x70e   : > { %1968 = vmatpush1.bf16.msra.mxu0 %v3385_v7  ;;  %v3445_v7 = vld [vmem:[%s3839_s4 + $0xd0] sm:$0xff]  }
 0x70f   : > { %1969 = vmatprep.subr.bf16.mxu0 %v3393_v8  ;;  %v3447_v8 = vld [vmem:[%s3839_s4 + $0x90] sm:$0xff]  }
 0x712   : > { %1970 = vmatpush1.bf16.msra.mxu0 %v3391_v10  ;;  %v3449_v10 = vld [vmem:[%s3839_s4 + $0xc8] sm:$0xff]  }
 0x713   : > { %1971 = vmatprep.subr.bf16.mxu0 %v3399_v14  ;;  %v3453_v14 = vld [vmem:[%s3839_s4 + $0xc0] sm:$0xff]  }
 0x716   : > { %1972 = vmatpush1.bf16.msra.mxu0 %v3397_v13  ;;  %v3452_v13 = vld [vmem:[%s3839_s4 + $0x40] sm:$0xff]  }
 0x717   : > { %1973 = vmatprep.subr.bf16.mxu0 %v3405_v16  ;;  %v3455_v16 = vld [vmem:[%s3839_s4 + $0x80] sm:$0xff]  }
 0x71a   : > { %1974 = vmatpush1.bf16.msra.mxu0 %v3403_v18 }
 0x71b   : > { %1975 = vmatprep.subr.bf16.mxu0 %v3411_v20 }
 0x71e   : > { %1976 = vmatpush1.bf16.msra.mxu0 %v3409_v23 }
 0x71f   : > { %1977 = vmatprep.subr.bf16.mxu0 %v3417_v25 }
 0x722   : > { %1978 = vmatpush1.bf16.msra.mxu0 %v3415_v27 }
 0x723   : > { %1979 = vmatprep.subr.bf16.mxu0 %v3423_v29 }
 0x726   : > { %1980 = vmatpush1.bf16.msra.mxu0 %v3421_v31 }
 0x727   : > { %3106 = vmatprep.subr.bf16.mxu0 %v3425_v33 }
 0x7c9   : > { %v1672_v59 = vpop.f32.mrf.mxu0 }
 0x7ca   : > { %v1678_v60 = vadd.f32 %v2907_v58, %v1672_v59  ;;  %v3435_v58 = vld [vmem:[%s3839_s4 + $0xa8] sm:$0xff]   ;;  %v3436_v59 = vld [vmem:[%s3839_s4 + $0x60] sm:$0xff]  }
 0x7cb   : > { %v3241_v61 = vpop.f32.mrf.mxu0 }
 0x7cc   : > { %v4004_v62 = vadd.f32 %v1678_v60, %v3877_v3  ;;  %v3390_v3 = vld [vmem:[%s3828_s3 + $0xa4] ss:$16 sps:$4 sm:$0xff]  }
 0x7cd   : > { %v1675_v63 = vpop.f32.mrf.mxu0  ;;  %1928 = vmatprep.subr.bf16.mxu1 %v3390_v3  ;;  %v3437_v60 = vld [vmem:[%s3839_s4 + $0xe0] sm:$0xff]   ;;  %v3446_v3 = vld [vmem:[%s3839_s4 + $0x10] sm:$0xff]  }
 0x7ce   : > { %1682 = vadd.xlane.f32.xlu1 %v4004_v62  ;;  %v1685_v0 = vmul.f32 %v4004_v62, %v4004_v62  ;;  %1929 = vmatpush1.bf16.msra.mxu1 %v3388_v9  ;;  %v3438_v61 = vld [vmem:[%s3839_s4 + $0x20] sm:$0xff]   ;;  %v3448_v9 = vld [vmem:[%s3839_s4 + $0x48] sm:$0xff]  }
 0x7cf   : > { %v3242_v1 = vpop.f32.mrf.mxu0  ;;  %1930 = vmatprep.subr.bf16.mxu1 %v3396_v12  ;;  %v3439_v63 = vld [vmem:[%s3839_s4 + $0xa0] sm:$0xff]   ;;  %v3451_v12 = vld [vmem:[%s3839_s4 + $0x88] sm:$0xff]  }
 0x7d0   : > { %1686 = vadd.xlane.f32.xlu0 %v1685_v0  ;;  %v3440_v0 = vld [vmem:[%s3839_s4 + $0x58] sm:$0xff]  }
 0x7d1   : > { %v3441_v1 = vld [vmem:[%s3839_s4 + $0xd8] sm:$0xff]  }
 0x7d2   : > { %1931 = vmatpush1.bf16.msra.mxu1 %v3394_v11  ;;  %v3450_v11 = vld [vmem:[%s3839_s4 + $0x8] sm:$0xff]  }
 0x7d3   : > { %1932 = vmatprep.subr.bf16.mxu1 %v3402_v15  ;;  %v3454_v15 = vld [vmem:[%s3839_s4] sm:$0xff]  }
 0x7d6   : > { %1933 = vmatpush1.bf16.msra.mxu1 %v3400_v17  ;;  %v1744_v17 = vlaneseq }
 0x7d7   : > { %1934 = vmatprep.subr.bf16.mxu1 %v3408_v19 }
 0x7d8   : > { %v4082_v18 = vshrl.u32 %v1744_v17, 7 }
 0x7da   : > { %1935 = vmatpush1.bf16.msra.mxu1 %v3406_v22  ;;  %v1746_v19 = vsub.s32 0, %v4082_v18  ;;  %v1754_v20 = vsub.s32 2, %v4082_v18  ;;  %v1750_v22 = vsub.s32 1, %v4082_v18  ;;  %v1758_v23 = vsub.s32 3, %v4082_v18 }
 0x7db   : > { %1936 = vmatprep.subr.bf16.mxu1 %v3414_v24  ;;  %vm2587_vm5 = vcmp.gt.s32.totalorder %v4082_v18, 0 }
 0x7dc   : > { %v1747_v24 = vrot.slane %v1742_v21, %v1746_v19  ;;  %v1755_v25 = vrot.slane %v1742_v21, %v1754_v20  ;;  %v1759_v29 = vrot.slane %v1742_v21, %v1758_v23  ;;  %v3457_v19 = vld [vmem:[%s3856_s12 + $0x30] sm:$0xff]   ;;  %v3458_v20 = vld [vmem:[%s3856_s12 + $0x28] sm:$0xff]  }
 0x7dd   : > { %v3462_v23 = vld [vmem:[%s3856_s12 + $0x8] sm:$0xff]  }
 0x7de   : > { %1937 = vmatpush1.bf16.msra.mxu1 %v3412_v26 }
 0x7df   : > { %1938 = vmatprep.subr.bf16.mxu1 %v3420_v28  ;;  %v1751_v28 = vrot.slane %v1742_v21, %v1750_v22  ;;  %v3460_v21 = vld [vmem:[%s3856_s12 + $0x18] sm:$0xff]   ;;  %v3461_v22 = vld [vmem:[%s3856_s12 + $0x10] sm:$0xff]  }
 0x7e2   : > { %1939 = vmatpush1.bf16.msra.mxu1 %v3418_v30 }
 0x7e3   : > { %3084 = vmatprep.subr.bf16.mxu1 %v3424_v32 }
 0x857   : > { %v1683_v34 = vpop.xlane.xlu1 %1682 }
 0x858   : > { %v1684_v35 = vmul.f32 0.0078125, %v1683_v34 }
 0x859   : > { %v1687_v36 = vpop.xlane.xlu0 %1686 }
 0x85a   : > { %v1689_v37 = vmul.f32 %v1684_v35, %v1684_v35  ;;  %v1688_v38 = vmul.f32 0.0078125, %v1687_v36  ;;  %v1691_v41 = vsub.f32 %v4004_v62, %v1684_v35 }
 0x85c   : > { %v1690_v39 = vsub.f32 %v1688_v38, %v1689_v37 }
 0x85e   : > { %v1692_v40 = vadd.f32 1e-05, %v1690_v39 }
 0x860   : > { %3475 = vrsqrt.f32 %v1692_v40 }
 0x86d   : > { %v3476_v42 = vpop.eup %3475 }
 0x86e   : > { %v1694_v44 = vmul.f32 %v3476_v42, %v1691_v41 }
 0x870   : > { %v1701_v46 = vmul.f32 %v2944_v43, %v1694_v44 }
 0x872   : > { %v1708_v47 = vadd.f32 %v2945_v45, %v1701_v46 }
 0x874   : > { %v1709_v50 = vpack.c.bf16 %v1708_v47, %v1708_v47 }
 0x876   : > { %1957 = vmatmul.mubr.bf16.vlgmr.msra.gmra.mxu1 %v1709_v50  ;;  %1998 = vmatmul.mubr.bf16.vlgmr.msra.gmra.mxu0 %v1709_v50 }
 0x877   : > { %3085 = vmatpush3.bf16.msra.mxu1 %v3426_v48  ;;  %3107 = vmatpush3.bf16.msra.mxu0 %v3427_v49 }
 0x878   : > { %3086 = vmatprep.subr.bf16.mxu1 %v3428_v51  ;;  %3108 = vmatprep.subr.bf16.mxu0 %v3429_v52 }
 0x87b   : > { %3087 = vmatpush3.bf16.msra.mxu1 %v3430_v53  ;;  %3109 = vmatpush3.bf16.msra.mxu0 %v3431_v54 }
 0x87c   : > { %3088 = vmatprep.subr.bf16.mxu1 %v3432_v55  ;;  %3110 = vmatprep.subr.bf16.mxu0 %v3433_v56 }
 0x87f   : > { %3089 = vmatpush3.bf16.msra.mxu1 %v3434_v57  ;;  %3111 = vmatpush3.bf16.msra.mxu0 %v3435_v58 }
 0x880   : > { %3090 = vmatprep.subr.bf16.mxu1 %v3436_v59  ;;  %3112 = vmatprep.subr.bf16.mxu0 %v3437_v60 }
 0x883   : > { %3091 = vmatpush3.bf16.msra.mxu1 %v3438_v61  ;;  %3113 = vmatpush3.bf16.msra.mxu0 %v3439_v63 }
 0x884   : > { %3092 = vmatprep.subr.bf16.mxu1 %v3440_v0  ;;  %3114 = vmatprep.subr.bf16.mxu0 %v3441_v1  ;;  %v3456_v1 = vld [vmem:[%s3856_s12 + $0x38] sm:$0xff]  }
 0x887   : > { %3093 = vmatpush3.bf16.msra.mxu1 %v3442_v2  ;;  %3115 = vmatpush3.bf16.msra.mxu0 %v3443_v5 }
 0x888   : > { %3094 = vmatprep.subr.bf16.mxu1 %v3444_v6  ;;  %3116 = vmatprep.subr.bf16.mxu0 %v3445_v7 }
 0x88b   : > { %3095 = vmatpush3.bf16.msra.mxu1 %v3446_v3  ;;  %3117 = vmatpush3.bf16.msra.mxu0 %v3447_v8 }
 0x88c   : > { %3096 = vmatprep.subr.bf16.mxu1 %v3448_v9  ;;  %3118 = vmatprep.subr.bf16.mxu0 %v3449_v10 }
 0x88f   : > { %3097 = vmatpush3.bf16.msra.mxu1 %v3450_v11  ;;  %3119 = vmatpush3.bf16.msra.mxu0 %v3451_v12 }
 0x890   : > { %3098 = vmatprep.subr.bf16.mxu1 %v3452_v13  ;;  %3120 = vmatprep.subr.bf16.mxu0 %v3453_v14  ;;  %v3010_v13 = vld [vmem:[%s4302_s17] ss:$0 sm:$0xff] }
 0x893   : > { %3099 = vmatpush3.bf16.msra.mxu1 %v3454_v15  ;;  %3121 = vmatpush3.bf16.msra.mxu0 %v3455_v16 }
 0x894   : > { %3243 = vmatprep.subr.bf16.mxu1 %v3585_v4  ;;  %3263 = vmatprep.subr.bf16.mxu0 %v3585_v4 }
 0x936   : > { %v1958_v26 = vpop.f32.mrf.mxu1  ;;  %v1999_v27 = vpop.f32.mrf.mxu0 }
 0x937   : > { %v1959_v30 = vadd.f32 %v1958_v26, %v1747_v24  ;;  %v2000_v31 = vadd.f32 %v1999_v27, %v1755_v25  ;;  %v3463_v24 = vld [vmem:[%s3856_s12] sm:$0xff]  }
 0x938   : > { %v1960_v32 = vpop.f32.mrf.mxu1  ;;  %v2001_v33 = vpop.f32.mrf.mxu0 }
 0x939   : > { %v2010_v34 = vmul.f32 0.70710677, %v1959_v30  ;;  %v2012_v35 = vmul.f32 0.70710677, %v2000_v31  ;;  %v1961_v36 = vadd.f32 %v1960_v32, %v1751_v28  ;;  %v2002_v37 = vadd.f32 %v2001_v33, %v1759_v29 }
 0x93a   : > { %v1962_v38 = vpop.f32.mrf.mxu1  ;;  %v2003_v39 = vpop.f32.mrf.mxu0  ;;  %v2006_v49 = vmul.f32 0.5, %v1959_v30  ;;  %v2008_v51 = vmul.f32 0.5, %v2000_v31 }
 0x93b   : > { %3477 = verf.f32 %v2010_v34  ;;  %v2011_v40 = vmul.f32 0.70710677, %v1961_v36  ;;  %v2013_v43 = vmul.f32 0.70710677, %v2002_v37  ;;  %v2007_v52 = vmul.f32 0.5, %v1961_v36 }
 0x93c   : > { %3479 = verf.f32 %v2012_v35  ;;  %v1963_v41 = vpop.f32.mrf.mxu1  ;;  %v2004_v42 = vpop.f32.mrf.mxu0  ;;  %v2009_v55 = vmul.f32 0.5, %v2002_v37  ;;  %v3012_v36 = vld [vmem:[%s964_s8] ss:$0 sm:$0xff] }
 0x93d   : > { %3481 = verf.f32 %v2011_v40  ;;  %v3464_v40 = vld [vmem:[%s3866_s14] sm:$0xff]  }
 0x93e   : > { %3483 = verf.f32 %v2013_v43  ;;  %v3013_v41 = vld [vmem:[%s972_s13] ss:$0 sm:$0xff] }
 0x948   : > { %v3478_v44 = vpop.eup %3477 }
 0x949   : > { %v3480_v45 = vpop.eup %3479  ;;  %v2018_v46 = vadd.f32 1.0, %v3478_v44 }
 0x94a   : > { %v2020_v47 = vadd.f32 1.0, %v3480_v45  ;;  %v3482_v48 = vpop.eup %3481 }
 0x94b   : > { %v3484_v50 = vpop.eup %3483  ;;  %v2019_v53 = vadd.f32 1.0, %v3482_v48  ;;  %v2022_v54 = vmul.f32 %v2018_v46, %v2006_v49 }
 0x94c   : > { %v2021_v56 = vadd.f32 1.0, %v3484_v50  ;;  %v2024_v57 = vmul.f32 %v2020_v47, %v2008_v51 }
 0x94d   : > { %v2023_v58 = vmul.f32 %v2019_v53, %v2007_v52  ;;  %v2026_v61 = vpack.c.bf16 %v2022_v54, %v2022_v54  ;;  %v3023_v54 = vld [vmem:[%s980_s11] ss:$0 sm:$0xff] }
 0x94e   : > { %v2025_v59 = vmul.f32 %v2021_v56, %v2009_v55  ;;  %v2028_v0 = vpack.c.bf16 %v2024_v57, %v2024_v57  ;;  %v3026_v57 = vsel %vm2587_vm5, 1.0, %v3585_v4 }
 0x94f   : > { %v2027_v60 = vpack.c.bf16 %v2023_v58, %v2023_v58 }
 0x950   : > { %v2029_v63 = vpack.c.bf16 %v2025_v59, %v2025_v59 }
 0x951   : > { %2318 = vmatprep.mubr.bf16.mxu1 %v2027_v60 }
 0x952   : > { %2358 = vmatprep.mubr.bf16.mxu0 %v2029_v63  ;;  %2319 = vmatmul.mubr.bf16.vlgmr.msra.gmra.mxu1 %v2026_v61 }
 0x953   : > { %2359 = vmatmul.mubr.bf16.vlgmr.msra.gmra.mxu0 %v2028_v0  ;;  %3259 = vmatprep.mubr.msk.bf16.mxu1 %vm3586_vm0, %v3585_v4 }
 0x954   : > { %3265 = vmatprep.mubr.msk.bf16.mxu0 %vm3586_vm0, %v3585_v4  ;;  %3244 = vmatpush3.bf16.msra.mxu1 %v3456_v1 }
 0x955   : > { %3245 = vmatprep.subr.bf16.mxu1 %v3585_v4  ;;  %3264 = vmatpush3.bf16.msra.mxu0 %v3464_v40 }
 0x958   : > { %3246 = vmatpush3.bf16.msra.mxu1 %v3457_v19 }
 0x959   : > { %3247 = vmatprep.subr.bf16.mxu1 %v3585_v4 }
 0x95c   : > { %3248 = vmatpush3.bf16.msra.mxu1 %v3458_v20 }
 0x95d   : > { %3249 = vmatprep.subr.bf16.mxu1 %v3585_v4 }
 0xa12   : > { %v3100_v2 = vpop.f32.mrf.mxu1 }
 0xa13   : > { %v3122_v5 = vpop.f32.mrf.mxu0 }
 0xa14   : > { %v3101_v6 = vpop.f32.mrf.mxu1 }
 0xa15   : > { %v3102_v7 = vadd.f32 %v3101_v6, %v3100_v2  ;;  %v3123_v3 = vpop.f32.mrf.mxu0 }
 0xa16   : > { %v3124_v8 = vadd.f32 %v3123_v3, %v3122_v5  ;;  %v3103_v9 = vpop.f32.mrf.mxu1 }
 0xa17   : > { %v3125_v10 = vpop.f32.mrf.mxu0 }
 0xa18   : > { %v2361_v11 = vadd.f32 %v3124_v8, %v3102_v7  ;;  %v3104_v12 = vpop.f32.mrf.mxu1 }
 0xa19   : > { %v3126_v14 = vpop.f32.mrf.mxu0 }
 0xa1a   : > { %v2366_v15 = vadd.f32 %v2361_v11, %v4004_v62  ;;  %v3459_v62 = vld [vmem:[%s3856_s12 + $0x20] sm:$0xff]   ;;  %s4303_s12 = scalar_lea.vmem %s4210_s15, %s3778_s2 }
 0xa1b   : > { %3250 = vmatpush3.bf16.msra.mxu1 %v3459_v62  ;;  %v3011_v34 = vld [vmem:[%s4303_s12] ss:$0 sm:$0xff] }
 0xa1c   : > { %v4101_v16 = vadd.f32 %v3010_v13, %v2366_v15  ;;  %3251 = vmatprep.subr.bf16.mxu1 %v3585_v4 }
 0xa1e   : > { %2377 = vadd.xlane.f32.xlu0 %v4101_v16  ;;  %v2380_v17 = vmul.f32 %v4101_v16, %v4101_v16 }
 0xa1f   : > { %3252 = vmatpush3.bf16.msra.mxu1 %v3460_v21 }
 0xa20   : > { %2381 = vadd.xlane.f32.xlu1 %v2380_v17  ;;  %3253 = vmatprep.subr.bf16.mxu1 %v3585_v4 }
 0xa23   : > { %3254 = vmatpush3.bf16.msra.mxu1 %v3461_v22 }
 0xa24   : > { %3255 = vmatprep.subr.bf16.mxu1 %v3585_v4 }
 0xa27   : > { %3256 = vmatpush3.bf16.msra.mxu1 %v3462_v23 }
 0xa28   : > { %3257 = vmatprep.subr.bf16.mxu1 %v3585_v4 }
 0xa2b   : > { %3258 = vmatpush3.bf16.msra.mxu1 %v3463_v24 }
 0xaa7   : > { %v2378_v25 = vpop.xlane.xlu0 %2377 }
 0xaa8   : > { %v2379_v26 = vmul.f32 0.0078125, %v2378_v25 }
 0xaa9   : > { %v2382_v27 = vpop.xlane.xlu1 %2381 }
 0xaaa   : > { %v2384_v28 = vmul.f32 %v2379_v26, %v2379_v26  ;;  %v2383_v29 = vmul.f32 0.0078125, %v2382_v27  ;;  %v2386_v32 = vsub.f32 %v4101_v16, %v2379_v26 }
 0xaac   : > { %v2385_v30 = vsub.f32 %v2383_v29, %v2384_v28 }
 0xaae   : > { %v2387_v31 = vadd.f32 1e-05, %v2385_v30 }
 0xab0   : > { %3485 = vrsqrt.f32 %v2387_v31 }
 0xabd   : > { %v3486_v33 = vpop.eup %3485 }
 0xabe   : > { %v2389_v35 = vmul.f32 %v3486_v33, %v2386_v32 }
 0xac0   : > { %v2396_v37 = vmul.f32 %v3011_v34, %v2389_v35 }
 0xac2   : > { %v2403_v38 = vadd.f32 %v3012_v36, %v2396_v37 }
 0xac4   : > { %v2404_v39 = vpack.c.bf16 %v2403_v38, %v2403_v38 }
 0xac6   : > { %3260 = vmatmul.mubr.bf16.vlgmr.msra.gmra.mxu1 %v2404_v39 }
 0xb86   : > { %v2510_v42 = vpop.f32.mrf.mxu1 }
 0xb87   : > { %v2511_v43 = vadd.f32 %v3013_v41, %v2510_v42 }
 0xb88   : > { %v3261_v44 = vpop.f32.mrf.mxu1 }
 0xb89   : > { %v3022_v45 = vmul.f32 -1.702, %v2511_v43 }
 0xb8a   : > { %v2513_v46 = vpop.f32.mrf.mxu1 }
 0xb8b   : > { %v2518_v47 = vmul.f32 1.442695, %v3022_v45 }
 0xb8c   : > { %v3262_v48 = vpop.f32.mrf.mxu1 }
 0xb8d   : > { %3487 = vpow2.f32 %v2518_v47 }
 0xb9a   : > { %v3488_v49 = vpop.eup %3487 }
 0xb9b   : > { %v2520_v50 = vadd.f32 1.0, %v3488_v49 }
 0xb9d   : > { %3489 = vrcp.f32 %v2520_v50 }
 0xbaa   : > { %v3490_v51 = vpop.eup %3489 }
 0xbab   : > { %v2523_v52 = vmul.f32 %v3490_v51, %v2511_v43 }
 0xbad   : > { %v2524_v53 = vpack.c.bf16 %v2523_v52, %v2523_v52 }
 0xbaf   : > { %3266 = vmatmul.mubr.msk.bf16.vlgmr.msra.gmra.mxu0 %vm2540_vm4, %v2524_v53 }
 0xc6f   : > { %v2578_v55 = vpop.f32.mrf.mxu0 }
 0xc70   : > { %v2579_v56 = vadd.f32 %v3023_v54, %v2578_v55 }
 0xc71   : > { %v3267_v58 = vpop.f32.mrf.mxu0 }
 0xc72   : > { %v2584_v59 = vmul.f32 0.7, %v2579_v56 }
 0xc73   : > { %v2581_v60 = vpop.f32.mrf.mxu0 }
 0xc74   : > { %v2590_v61 = vmul.f32 %v3026_v57, %v2584_v59  ;;  %2596 = sbr.rel (%p3027_p1) target bundleno = 3194 (0xc7a), region = 112 }
 0xc75   : > { %v3268_v63 = vpop.f32.mrf.mxu0 }
 0xc76   : > { %v2591_v0 = vadd.f32 %v2590_v61, %v4101_v16 }
 0xc78   : > { %2592 = vst [vmem:[#allocation2] sm:$0xff] %v2591_v0 }
 0xc79   : > { %2597 = vst [vmem:[%s902_s9] sm:$0xff] %v2591_v0 }
 0xc7a PF: > { %s4308_s2 = sld [smem:[#allocation10_spill]]  ;;  %s2612_s7 = sshll.u32 %s902_s9, 4  ;;  %s2613_s7 = int_to_ptr.vmem [resolvable:$true] %s2612_s7 }
 0xc7b   : > { %s4309_s11 = sld [smem:[#allocation7_spill]]  ;;  %s3491_s4 = scalar_lea.vmem %s2613_s7, 128 }
 0xc7c   : > { %s4311_s21 = sld [smem:[#allocation40_spill]]  ;;  %p3492_p2 = scmp.ne.s32.totalorder %s2613_s7, %s3491_s4 }
 0xc7d   : > { %s3589_s1 = smov [#allocation3]  }
 0xc7e   : > { %p3493_p4 = pnand %p3492_p2, %p3749_p3  ;;  %s3495_s24 = sshll.u32 %s3589_s1, 4  ;;  %s3496_s24 = int_to_ptr.vmem [resolvable:$false] %s3495_s24 }
 0xc7f   : > { %s3497_s17 = scalar_lea.vmem %s3496_s24, 256  ;;  %p3498_p6 = scmp.lt.s32.totalorder %s2613_s7, %s3496_s24 }
 0xc80   : > { %s3029_s29 = sshll.u32 %s4308_s2, 7  ;;  %p3494_p5 = pneg %p3493_p4 }
 0xc81   : > { %s4312_s23 = sand.u32 1, %s4309_s11   ;;  %p3499_p7 = scmp.lt.s32.totalorder %s3497_s17, %s3491_s4 }
 0xc82   : > { %s2610_s20 = scalar_lea.hbm %s4311_s21, %s3029_s29  ;;  %s2599_s5 = scalar_lea.sflag [#allocation4], %s4312_s23 }
 0xc83   : > { %p3500_p8 = por %p3499_p7, %p3498_p6 }
 0xc85   : > { %p3501_p10 = pnand %p3500_p8, %p3494_p5 }
 0xc87   : > { %3504 = shalt.err (!%p3501_p10)
}
 0xc88   : > { %s3505_s26 = scalar_lea.hbm %s2610_s20, 128  ;;  %s3509_s6 = scalar_lea.hbm %s4311_s21, 512 }
 0xc89   : > { %p3506_p11 = scmp.ne.s32.totalorder %s2610_s20, %s3505_s26  ;;  %p3510_p0 = scmp.lt.s32.totalorder %s2610_s20, %s4311_s21 }
 0xc8a   : > { %p3511_p1 = scmp.lt.s32.totalorder %s3509_s6, %s3505_s26 }
 0xc8b   : > { %p3507_p12 = pnand %p3506_p11, %p3749_p3 }
 0xc8c   : > { %p3512_p2 = por %p3511_p1, %p3510_p0 }
 0xc8d   : > { %p3508_p13 = pneg %p3507_p12 }
 0xc8f   : > { %p3513_p4 = pnand %p3512_p2, %p3508_p13 }
 0xc91   : > { %3516 = shalt.err (!%p3513_p4)
}
 0xc92   : > { %3269 = dma.vmem_to_hbm [thread:$0]  (%p3749_p3), %s2613_s7, 128, %s2610_s20, %s2599_s5  }
 0xc93 PF: > { %s4313_s19 = sld [smem:[#allocation13_spill]] }
 0xc94   : > { %s4314_s27 = sld [smem:[#allocation6_spill]] }
 0xc99   : > { %p3275_p5 = scmp.ge.s32.totalorder %s4313_s19, 2 }
 0xc9a   : > { %s2624_s30 = sand.u32 1, %s4314_s27  }
 0xc9b   : > { %p3272_p6 = pnand %p3275_p5, %p3759_p9  ;;  %s2625_s16 = scalar_lea.sflag [#allocation4], %s2624_s30 }
 0xc9d   : > { %p3273_p7 = pneg %p3272_p6 }
 0xc9f   : > { %3550 = dma.done.wait (%p3273_p7), %s2625_s16, 128  }
 0xca0   : > { %3552 = vsyncadd (%p3273_p7), %s2625_s16, 4294967168  ;;  %s34_s0 = sadd.s32 1, %s4313_s19   ;;  %s4316_s2 = sld [smem:[#allocation7_spill]] }
 0xca1   : > { %p31_p8 = scmp.ge.s32.totalorder %s34_s0, 10   ;;  %s4317_s25 = sld [smem:[#allocation8_spill]] }
 0xca2   : > { %s4318_s26 = sld [smem:[#allocation18_spill]] }
 0xca3   : > { %s4319_s27 = sld [smem:[#allocation11_spill]]  ;;  %33 = sbr.rel (!%p31_p8) target bundleno = 27 (0x1b), region = 204 }
 0xca4   : > { %s4320_s3 = sld [smem:[#allocation12_spill]] }
 0xca5   : > { %s4321_s28 = sld [smem:[#allocation14_spill]] }
 0xca6   : > { %s4322_s29 = sld [smem:[#allocation16_spill]] }
 0xca8   :  { %2630 = vsyncpa [#allocation4], 1 }
 0xca9   :  { %2632 = vsyncpa [#allocation4 + $0x1], 1 }

</bundles_post_ra>
